<compile_context>
chip_gen: v6e
topology: v6e:2x2x1
jax: 0.10.0
libtpu: 0.0.40
codegen_flags: <defaults>
</compile_context>

<pallas_src>
import functools

import jax
import jax.numpy as jnp
from jax import lax
from jax.experimental import pallas as pl
from jax.experimental.pallas import tpu as pltpu


def _plasticnet_seq_kernel(
    T,              # static trip count (Python int, closed over)
    base_ref,       # (T, B, H)  VMEM: x_t @ Wi + bi + hidden @ w (loop-invariant, precomputed)
    hidden_ref,     # (B, H)     VMEM
    hidden_r_ref,   # (H, B)     VMEM (torch's hidden.view(-1, batch_size): row-major reshape)
    hebb0_ref,      # (H, H)     VMEM initial plastic trace
    alpha_ref,      # (H, H)     VMEM
    wo_ref,         # (H, O)     VMEM
    bo_ref,         # (1, O)     VMEM
    eta_ref,        # (1,)       SMEM scalar
    out_ref,        # (T, B, O)  VMEM output (softmax probabilities per step)
    hebb_out_ref,   # (H, H)     VMEM output (final trace)
):
    # Hoist every loop-invariant load / scalar above the serial loop.
    eta = eta_ref[0]
    one_minus_eta = 1.0 - eta
    hidden = hidden_ref[...]
    hidden_r = hidden_r_ref[...]
    alpha = alpha_ref[...]
    wo = wo_ref[...]
    bo = bo_ref[...]

    def step(t, hebb):
        # Recurrent (sequential) part only: hidden @ (alpha * hebb).
        rec = jnp.dot(hidden, alpha * hebb, preferred_element_type=jnp.float32)
        hout = jnp.tanh(base_ref[t] + rec)

        # Hebbian trace update: (H,B) row-major view of hidden (torch .view(-1, B)).
        outer = jnp.dot(hidden_r, hout, preferred_element_type=jnp.float32)
        hebb_new = one_minus_eta * hebb + eta * outer

        # Readout + exact softmax(-1)  (exact divide so rows sum to 1).
        logits = jnp.dot(hout, wo, preferred_element_type=jnp.float32) + bo
        m = jnp.max(logits, axis=-1, keepdims=True)
        e = jnp.exp(logits - m)
        out_ref[t] = e / jnp.sum(e, axis=-1, keepdims=True)
        return hebb_new

    hebb_final = lax.fori_loop(0, T, step, hebb0_ref[...], unroll=True)
    hebb_out_ref[...] = hebb_final


@jax.jit
def plasticnet_forward_seq(x_seq, hidden, hebb, params):
    """Run the PlasticNet cell over a whole sequence in one fused pallas_call.

    x_seq: (T, B, I). Returns (out_seq (T,B,O), hidden (unchanged), hebb_final (H,H)).
    """
    T, B, I = x_seq.shape
    H = hidden.shape[1]
    O = params["w_h2o"].shape[1]

    # Hoist the loop-invariant terms out of the serial recurrence and compute them as one
    # dense XLA matmul: base[t] = x_t @ Wi + bi + hidden @ w  (hidden is constant over t).
    xproj = jnp.dot(x_seq.reshape(T * B, I), params["w_i2h"]).reshape(T, B, H)
    base = xproj + params["b_i2h"] + jnp.dot(hidden, params["w"])

    # torch: hidden.view(-1, batch_size) -- row-major reshape, NOT a transpose.
    hidden_r = jnp.reshape(hidden, (H, B))

    vmem = pl.BlockSpec(memory_space=pltpu.MemorySpace.VMEM)
    smem = pl.BlockSpec(memory_space=pltpu.MemorySpace.SMEM)

    out_seq, hebb_new = pl.pallas_call(
        functools.partial(_plasticnet_seq_kernel, T),
        out_shape=(
            jax.ShapeDtypeStruct((T, B, O), jnp.float32),
            jax.ShapeDtypeStruct((H, H), jnp.float32),
        ),
        in_specs=[vmem, vmem, vmem, vmem, vmem, vmem, vmem, smem],
        out_specs=(vmem, vmem),
    )(
        base, hidden, hidden_r, hebb,
        params["alpha"], params["w_h2o"], params["b_h2o"], params["eta"],
    )
    return out_seq, hidden, hebb_new


def plasticnet_forward(x, hidden, hebb, params):
    """Single-step entry point with the same signature/semantics as the module's forward."""
    out_seq, hidden, hebb_new = plasticnet_forward_seq(x[None], hidden, hebb, params)
    return out_seq[0], hidden, hebb_new


def init_params(key, input_dim, hidden_dim, output_dim):
    k = jax.random.split(key, 6)
    ki = 1.0 / jnp.sqrt(jnp.float32(input_dim))
    kh = 1.0 / jnp.sqrt(jnp.float32(hidden_dim))
    return {
        # nn.Linear(input_dim, hidden_dim)  (stored transposed: (I, H), so kernel does x @ W)
        "w_i2h": jax.random.uniform(k[0], (input_dim, hidden_dim), jnp.float32, -ki, ki),
        "b_i2h": jax.random.uniform(k[1], (1, hidden_dim), jnp.float32, -ki, ki),
        # plastic weights
        "w": 0.01 * jax.random.normal(k[2], (hidden_dim, hidden_dim), jnp.float32),
        "alpha": 0.01 * jax.random.normal(k[3], (hidden_dim, hidden_dim), jnp.float32),
        "eta": jnp.full((1,), 0.01, jnp.float32),
        # nn.Linear(hidden_dim, output_dim)  (stored transposed: (H, O))
        "w_h2o": jax.random.uniform(k[4], (hidden_dim, output_dim), jnp.float32, -kh, kh),
        "b_h2o": jax.random.uniform(k[5], (1, output_dim), jnp.float32, -kh, kh),
    }


if __name__ == "__main__":
    input_dim, hidden_dim, output_dim, batch_size, seq_len = 16, 32, 16, 8, 8

    key = jax.random.PRNGKey(0)
    kp, kx, kh, kb = jax.random.split(key, 4)

    params = init_params(kp, input_dim, hidden_dim, output_dim)
    x_seq = jax.random.normal(kx, (seq_len, batch_size, input_dim), jnp.float32)
    hidden = jax.random.normal(kh, (batch_size, hidden_dim), jnp.float32)
    hebb0 = 0.01 * jax.random.normal(kb, (hidden_dim, hidden_dim), jnp.float32)

    # Fused whole-sequence call.
    out_seq, hidden_out, hebb_new = plasticnet_forward_seq(x_seq, hidden, hebb0, params)
    jax.block_until_ready((out_seq, hidden_out, hebb_new))

    assert out_seq.shape == (seq_len, batch_size, output_dim)
    assert hidden_out.shape == (batch_size, hidden_dim)
    assert hebb_new.shape == (hidden_dim, hidden_dim)

    # Pure-JAX reference for a numerical sanity check (same recurrence as the PyTorch module).
    def ref_step(x, hid, hebb, p):
        hp = jax.lax.Precision.HIGHEST
        hi = jnp.dot(x, p["w_i2h"], precision=hp) + p["b_i2h"]
        rec = jnp.dot(hid, p["w"] + p["alpha"] * hebb, precision=hp)
        hout = jnp.tanh(hi + rec)
        hv = jnp.reshape(hid, (hid.shape[1], hid.shape[0]))
        hebb = (1.0 - p["eta"][0]) * hebb + p["eta"][0] * jnp.dot(hv, hout, precision=hp)
        out = jax.nn.softmax(jnp.dot(hout, p["w_h2o"], precision=hp) + p["b_h2o"], axis=-1)
        return out, hebb

    hebb_r = hebb0
    outs_r = []
    for t in range(seq_len):
        o, hebb_r = ref_step(x_seq[t], hidden, hebb_r, params)
        outs_r.append(o)
    out_r = jnp.stack(outs_r, axis=0)

    # Exact softmax divide -> rows sum to 1 up to float rounding.
    assert jnp.allclose(jnp.sum(out_seq, axis=-1), 1.0, atol=1e-3)
    assert jnp.allclose(out_seq, out_r, atol=2e-2), float(jnp.max(jnp.abs(out_seq - out_r)))
    assert jnp.allclose(hebb_new, hebb_r, atol=2e-3), float(jnp.max(jnp.abs(hebb_new - hebb_r)))
    assert jnp.allclose(hidden_out, hidden)

    # Single-step entry point (exact module forward signature) still works.
    out1, hid1, hebb1 = plasticnet_forward(x_seq[0], hidden, hebb0, params)
    jax.block_until_ready((out1, hid1, hebb1))
    assert out1.shape == (batch_size, output_dim)
    assert jnp.allclose(jnp.sum(out1, axis=-1), 1.0, atol=1e-3)

    print("KERNEL_OK")
</pallas_src>

<mosaic_0001>
module attributes {stable_mosaic.version = 11 : i64} {
  func.func @_plasticnet_seq_kernel(%arg0: memref<8x8x32xf32, #tpu.memory_space<vmem>>, %arg1: memref<8x32xf32, #tpu.memory_space<vmem>>, %arg2: memref<32x8xf32, #tpu.memory_space<vmem>>, %arg3: memref<32x32xf32, #tpu.memory_space<vmem>>, %arg4: memref<32x32xf32, #tpu.memory_space<vmem>>, %arg5: memref<32x16xf32, #tpu.memory_space<vmem>>, %arg6: memref<1x16xf32, #tpu.memory_space<vmem>>, %arg7: memref<1xf32, #tpu.memory_space<smem>>, %arg8: memref<8x8x16xf32, #tpu.memory_space<vmem>>, %arg9: memref<32x32xf32, #tpu.memory_space<vmem>>) attributes {dimension_semantics = [], scalar_prefetch = 0 : i64, scratch_operands = 0 : i64, tpu.core_type = #tpu.core_type<tc>} {
    %c0 = arith.constant 0 : index
    %0 = memref.load %arg7[%c0] : memref<1xf32, #tpu.memory_space<smem>>
    %cst = arith.constant 1.000000e+00 : f32
    %1 = arith.subf %cst, %0 : f32
    %c0_0 = arith.constant 0 : index
    %c0_1 = arith.constant 0 : index
    %2 = vector.load %arg1[%c0_0, %c0_1] : memref<8x32xf32, #tpu.memory_space<vmem>>, vector<8x32xf32>
    %c0_2 = arith.constant 0 : index
    %c0_3 = arith.constant 0 : index
    %3 = vector.load %arg2[%c0_2, %c0_3] : memref<32x8xf32, #tpu.memory_space<vmem>>, vector<32x8xf32>
    %c0_4 = arith.constant 0 : index
    %c0_5 = arith.constant 0 : index
    %4 = vector.load %arg4[%c0_4, %c0_5] : memref<32x32xf32, #tpu.memory_space<vmem>>, vector<32x32xf32>
    %c0_6 = arith.constant 0 : index
    %c0_7 = arith.constant 0 : index
    %5 = vector.load %arg5[%c0_6, %c0_7] : memref<32x16xf32, #tpu.memory_space<vmem>>, vector<32x16xf32>
    %c0_8 = arith.constant 0 : index
    %c0_9 = arith.constant 0 : index
    %6 = vector.load %arg6[%c0_8, %c0_9] : memref<1x16xf32, #tpu.memory_space<vmem>>, vector<1x16xf32>
    %c0_10 = arith.constant 0 : index
    %c0_11 = arith.constant 0 : index
    %7 = vector.load %arg3[%c0_10, %c0_11] : memref<32x32xf32, #tpu.memory_space<vmem>>, vector<32x32xf32>
    %c0_i32 = arith.constant 0 : i32
    %8 = arith.mulf %4, %7 : vector<32x32xf32>
    %cst_12 = arith.constant dense<0.000000e+00> : vector<8x32xf32>
    %9 = tpu.matmul %2, %8, %cst_12 {dimension_numbers = #tpu.dot_dimension_numbers<[1], [0], [0], [1], [0, 0, 1, 1], [], []>} : vector<8x32xf32>, vector<32x32xf32>, vector<8x32xf32> -> vector<8x32xf32>
    %10 = arith.index_cast %c0_i32 : i32 to index
    %c0_13 = arith.constant 0 : index
    %c0_14 = arith.constant 0 : index
    %11 = vector.load %arg0[%10, %c0_13, %c0_14] : memref<8x8x32xf32, #tpu.memory_space<vmem>>, vector<1x8x32xf32>
    %12 = vector.shape_cast %11 : vector<1x8x32xf32> to vector<8x32xf32>
    %13 = arith.addf %12, %9 : vector<8x32xf32>
    %14 = math.tanh %13 : vector<8x32xf32>
    %cst_15 = arith.constant dense<0.000000e+00> : vector<32x32xf32>
    %15 = tpu.matmul %3, %14, %cst_15 {dimension_numbers = #tpu.dot_dimension_numbers<[1], [0], [0], [1], [0, 0, 1, 1], [], []>} : vector<32x8xf32>, vector<8x32xf32>, vector<32x32xf32> -> vector<32x32xf32>
    %16 = vector.broadcast %1 : f32 to vector<32x32xf32>
    %17 = arith.mulf %16, %7 : vector<32x32xf32>
    %18 = vector.broadcast %0 : f32 to vector<32x32xf32>
    %19 = arith.mulf %18, %15 : vector<32x32xf32>
    %20 = arith.addf %17, %19 : vector<32x32xf32>
    %cst_16 = arith.constant dense<0.000000e+00> : vector<8x16xf32>
    %21 = tpu.matmul %14, %5, %cst_16 {dimension_numbers = #tpu.dot_dimension_numbers<[1], [0], [0], [1], [0, 0, 1, 1], [], []>} : vector<8x32xf32>, vector<32x16xf32>, vector<8x16xf32> -> vector<8x16xf32>
    %22 = vector.broadcast %6 : vector<1x16xf32> to vector<8x16xf32>
    %23 = arith.addf %21, %22 : vector<8x16xf32>
    %cst_17 = arith.constant dense<0xFF800000> : vector<8xf32>
    %24 = vector.multi_reduction <maximumf>, %23, %cst_17 [1] : vector<8x16xf32> to vector<8xf32>
    %25 = vector.shape_cast %24 : vector<8xf32> to vector<8x1xf32>
    %26 = vector.broadcast %25 : vector<8x1xf32> to vector<8x16xf32>
    %27 = arith.subf %23, %26 : vector<8x16xf32>
    %28 = math.exp %27 : vector<8x16xf32>
    %cst_18 = arith.constant dense<0.000000e+00> : vector<8xf32>
    %29 = vector.multi_reduction <add>, %28, %cst_18 [1] : vector<8x16xf32> to vector<8xf32>
    %30 = vector.shape_cast %29 : vector<8xf32> to vector<8x1xf32>
    %31 = vector.broadcast %30 : vector<8x1xf32> to vector<8x16xf32>
    %32 = arith.divf %28, %31 : vector<8x16xf32>
    %33 = arith.index_cast %c0_i32 : i32 to index
    %c0_19 = arith.constant 0 : index
    %c0_20 = arith.constant 0 : index
    %34 = vector.load %arg8[%33, %c0_19, %c0_20] : memref<8x8x16xf32, #tpu.memory_space<vmem>>, vector<1x8x16xf32>
    %35 = vector.shape_cast %34 : vector<1x8x16xf32> to vector<8x16xf32>
    %36 = vector.shape_cast %32 : vector<8x16xf32> to vector<1x8x16xf32>
    tpu.vector_store %arg8[%33, %c0_19, %c0_20], %36 {strides = array<i32>} : memref<8x8x16xf32, #tpu.memory_space<vmem>>, vector<1x8x16xf32>,
    %c1_i32 = arith.constant 1 : i32
    %37 = arith.mulf %4, %20 : vector<32x32xf32>
    %cst_21 = arith.constant dense<0.000000e+00> : vector<8x32xf32>
    %38 = tpu.matmul %2, %37, %cst_21 {dimension_numbers = #tpu.dot_dimension_numbers<[1], [0], [0], [1], [0, 0, 1, 1], [], []>} : vector<8x32xf32>, vector<32x32xf32>, vector<8x32xf32> -> vector<8x32xf32>
    %39 = arith.index_cast %c1_i32 : i32 to index
    %c0_22 = arith.constant 0 : index
    %c0_23 = arith.constant 0 : index
    %40 = vector.load %arg0[%39, %c0_22, %c0_23] : memref<8x8x32xf32, #tpu.memory_space<vmem>>, vector<1x8x32xf32>
    %41 = vector.shape_cast %40 : vector<1x8x32xf32> to vector<8x32xf32>
    %42 = arith.addf %41, %38 : vector<8x32xf32>
    %43 = math.tanh %42 : vector<8x32xf32>
    %cst_24 = arith.constant dense<0.000000e+00> : vector<32x32xf32>
    %44 = tpu.matmul %3, %43, %cst_24 {dimension_numbers = #tpu.dot_dimension_numbers<[1], [0], [0], [1], [0, 0, 1, 1], [], []>} : vector<32x8xf32>, vector<8x32xf32>, vector<32x32xf32> -> vector<32x32xf32>
    %45 = vector.broadcast %1 : f32 to vector<32x32xf32>
    %46 = arith.mulf %45, %20 : vector<32x32xf32>
    %47 = vector.broadcast %0 : f32 to vector<32x32xf32>
    %48 = arith.mulf %47, %44 : vector<32x32xf32>
    %49 = arith.addf %46, %48 : vector<32x32xf32>
    %cst_25 = arith.constant dense<0.000000e+00> : vector<8x16xf32>
    %50 = tpu.matmul %43, %5, %cst_25 {dimension_numbers = #tpu.dot_dimension_numbers<[1], [0], [0], [1], [0, 0, 1, 1], [], []>} : vector<8x32xf32>, vector<32x16xf32>, vector<8x16xf32> -> vector<8x16xf32>
    %51 = vector.broadcast %6 : vector<1x16xf32> to vector<8x16xf32>
    %52 = arith.addf %50, %51 : vector<8x16xf32>
    %cst_26 = arith.constant dense<0xFF800000> : vector<8xf32>
    %53 = vector.multi_reduction <maximumf>, %52, %cst_26 [1] : vector<8x16xf32> to vector<8xf32>
    %54 = vector.shape_cast %53 : vector<8xf32> to vector<8x1xf32>
    %55 = vector.broadcast %54 : vector<8x1xf32> to vector<8x16xf32>
    %56 = arith.subf %52, %55 : vector<8x16xf32>
    %57 = math.exp %56 : vector<8x16xf32>
    %cst_27 = arith.constant dense<0.000000e+00> : vector<8xf32>
    %58 = vector.multi_reduction <add>, %57, %cst_27 [1] : vector<8x16xf32> to vector<8xf32>
    %59 = vector.shape_cast %58 : vector<8xf32> to vector<8x1xf32>
    %60 = vector.broadcast %59 : vector<8x1xf32> to vector<8x16xf32>
    %61 = arith.divf %57, %60 : vector<8x16xf32>
    %62 = arith.index_cast %c1_i32 : i32 to index
    %c0_28 = arith.constant 0 : index
    %c0_29 = arith.constant 0 : index
    %63 = vector.load %arg8[%62, %c0_28, %c0_29] : memref<8x8x16xf32, #tpu.memory_space<vmem>>, vector<1x8x16xf32>
    %64 = vector.shape_cast %63 : vector<1x8x16xf32> to vector<8x16xf32>
    %65 = vector.shape_cast %61 : vector<8x16xf32> to vector<1x8x16xf32>
    tpu.vector_store %arg8[%62, %c0_28, %c0_29], %65 {strides = array<i32>} : memref<8x8x16xf32, #tpu.memory_space<vmem>>, vector<1x8x16xf32>,
    %c2_i32 = arith.constant 2 : i32
    %66 = arith.mulf %4, %49 : vector<32x32xf32>
    %cst_30 = arith.constant dense<0.000000e+00> : vector<8x32xf32>
    %67 = tpu.matmul %2, %66, %cst_30 {dimension_numbers = #tpu.dot_dimension_numbers<[1], [0], [0], [1], [0, 0, 1, 1], [], []>} : vector<8x32xf32>, vector<32x32xf32>, vector<8x32xf32> -> vector<8x32xf32>
    %68 = arith.index_cast %c2_i32 : i32 to index
    %c0_31 = arith.constant 0 : index
    %c0_32 = arith.constant 0 : index
    %69 = vector.load %arg0[%68, %c0_31, %c0_32] : memref<8x8x32xf32, #tpu.memory_space<vmem>>, vector<1x8x32xf32>
    %70 = vector.shape_cast %69 : vector<1x8x32xf32> to vector<8x32xf32>
    %71 = arith.addf %70, %67 : vector<8x32xf32>
    %72 = math.tanh %71 : vector<8x32xf32>
    %cst_33 = arith.constant dense<0.000000e+00> : vector<32x32xf32>
    %73 = tpu.matmul %3, %72, %cst_33 {dimension_numbers = #tpu.dot_dimension_numbers<[1], [0], [0], [1], [0, 0, 1, 1], [], []>} : vector<32x8xf32>, vector<8x32xf32>, vector<32x32xf32> -> vector<32x32xf32>
    %74 = vector.broadcast %1 : f32 to vector<32x32xf32>
    %75 = arith.mulf %74, %49 : vector<32x32xf32>
    %76 = vector.broadcast %0 : f32 to vector<32x32xf32>
    %77 = arith.mulf %76, %73 : vector<32x32xf32>
    %78 = arith.addf %75, %77 : vector<32x32xf32>
    %cst_34 = arith.constant dense<0.000000e+00> : vector<8x16xf32>
    %79 = tpu.matmul %72, %5, %cst_34 {dimension_numbers = #tpu.dot_dimension_numbers<[1], [0], [0], [1], [0, 0, 1, 1], [], []>} : vector<8x32xf32>, vector<32x16xf32>, vector<8x16xf32> -> vector<8x16xf32>
    %80 = vector.broadcast %6 : vector<1x16xf32> to vector<8x16xf32>
    %81 = arith.addf %79, %80 : vector<8x16xf32>
    %cst_35 = arith.constant dense<0xFF800000> : vector<8xf32>
    %82 = vector.multi_reduction <maximumf>, %81, %cst_35 [1] : vector<8x16xf32> to vector<8xf32>
    %83 = vector.shape_cast %82 : vector<8xf32> to vector<8x1xf32>
    %84 = vector.broadcast %83 : vector<8x1xf32> to vector<8x16xf32>
    %85 = arith.subf %81, %84 : vector<8x16xf32>
    %86 = math.exp %85 : vector<8x16xf32>
    %cst_36 = arith.constant dense<0.000000e+00> : vector<8xf32>
    %87 = vector.multi_reduction <add>, %86, %cst_36 [1] : vector<8x16xf32> to vector<8xf32>
    %88 = vector.shape_cast %87 : vector<8xf32> to vector<8x1xf32>
    %89 = vector.broadcast %88 : vector<8x1xf32> to vector<8x16xf32>
    %90 = arith.divf %86, %89 : vector<8x16xf32>
    %91 = arith.index_cast %c2_i32 : i32 to index
    %c0_37 = arith.constant 0 : index
    %c0_38 = arith.constant 0 : index
    %92 = vector.load %arg8[%91, %c0_37, %c0_38] : memref<8x8x16xf32, #tpu.memory_space<vmem>>, vector<1x8x16xf32>
    %93 = vector.shape_cast %92 : vector<1x8x16xf32> to vector<8x16xf32>
    %94 = vector.shape_cast %90 : vector<8x16xf32> to vector<1x8x16xf32>
    tpu.vector_store %arg8[%91, %c0_37, %c0_38], %94 {strides = array<i32>} : memref<8x8x16xf32, #tpu.memory_space<vmem>>, vector<1x8x16xf32>,
    %c3_i32 = arith.constant 3 : i32
    %95 = arith.mulf %4, %78 : vector<32x32xf32>
    %cst_39 = arith.constant dense<0.000000e+00> : vector<8x32xf32>
    %96 = tpu.matmul %2, %95, %cst_39 {dimension_numbers = #tpu.dot_dimension_numbers<[1], [0], [0], [1], [0, 0, 1, 1], [], []>} : vector<8x32xf32>, vector<32x32xf32>, vector<8x32xf32> -> vector<8x32xf32>
    %97 = arith.index_cast %c3_i32 : i32 to index
    %c0_40 = arith.constant 0 : index
    %c0_41 = arith.constant 0 : index
    %98 = vector.load %arg0[%97, %c0_40, %c0_41] : memref<8x8x32xf32, #tpu.memory_space<vmem>>, vector<1x8x32xf32>
    %99 = vector.shape_cast %98 : vector<1x8x32xf32> to vector<8x32xf32>
    %100 = arith.addf %99, %96 : vector<8x32xf32>
    %101 = math.tanh %100 : vector<8x32xf32>
    %cst_42 = arith.constant dense<0.000000e+00> : vector<32x32xf32>
    %102 = tpu.matmul %3, %101, %cst_42 {dimension_numbers = #tpu.dot_dimension_numbers<[1], [0], [0], [1], [0, 0, 1, 1], [], []>} : vector<32x8xf32>, vector<8x32xf32>, vector<32x32xf32> -> vector<32x32xf32>
    %103 = vector.broadcast %1 : f32 to vector<32x32xf32>
    %104 = arith.mulf %103, %78 : vector<32x32xf32>
    %105 = vector.broadcast %0 : f32 to vector<32x32xf32>
    %106 = arith.mulf %105, %102 : vector<32x32xf32>
    %107 = arith.addf %104, %106 : vector<32x32xf32>
    %cst_43 = arith.constant dense<0.000000e+00> : vector<8x16xf32>
    %108 = tpu.matmul %101, %5, %cst_43 {dimension_numbers = #tpu.dot_dimension_numbers<[1], [0], [0], [1], [0, 0, 1, 1], [], []>} : vector<8x32xf32>, vector<32x16xf32>, vector<8x16xf32> -> vector<8x16xf32>
    %109 = vector.broadcast %6 : vector<1x16xf32> to vector<8x16xf32>
    %110 = arith.addf %108, %109 : vector<8x16xf32>
    %cst_44 = arith.constant dense<0xFF800000> : vector<8xf32>
    %111 = vector.multi_reduction <maximumf>, %110, %cst_44 [1] : vector<8x16xf32> to vector<8xf32>
    %112 = vector.shape_cast %111 : vector<8xf32> to vector<8x1xf32>
    %113 = vector.broadcast %112 : vector<8x1xf32> to vector<8x16xf32>
    %114 = arith.subf %110, %113 : vector<8x16xf32>
    %115 = math.exp %114 : vector<8x16xf32>
    %cst_45 = arith.constant dense<0.000000e+00> : vector<8xf32>
    %116 = vector.multi_reduction <add>, %115, %cst_45 [1] : vector<8x16xf32> to vector<8xf32>
    %117 = vector.shape_cast %116 : vector<8xf32> to vector<8x1xf32>
    %118 = vector.broadcast %117 : vector<8x1xf32> to vector<8x16xf32>
    %119 = arith.divf %115, %118 : vector<8x16xf32>
    %120 = arith.index_cast %c3_i32 : i32 to index
    %c0_46 = arith.constant 0 : index
    %c0_47 = arith.constant 0 : index
    %121 = vector.load %arg8[%120, %c0_46, %c0_47] : memref<8x8x16xf32, #tpu.memory_space<vmem>>, vector<1x8x16xf32>
    %122 = vector.shape_cast %121 : vector<1x8x16xf32> to vector<8x16xf32>
    %123 = vector.shape_cast %119 : vector<8x16xf32> to vector<1x8x16xf32>
    tpu.vector_store %arg8[%120, %c0_46, %c0_47], %123 {strides = array<i32>} : memref<8x8x16xf32, #tpu.memory_space<vmem>>, vector<1x8x16xf32>,
    %c4_i32 = arith.constant 4 : i32
    %124 = arith.mulf %4, %107 : vector<32x32xf32>
    %cst_48 = arith.constant dense<0.000000e+00> : vector<8x32xf32>
    %125 = tpu.matmul %2, %124, %cst_48 {dimension_numbers = #tpu.dot_dimension_numbers<[1], [0], [0], [1], [0, 0, 1, 1], [], []>} : vector<8x32xf32>, vector<32x32xf32>, vector<8x32xf32> -> vector<8x32xf32>
    %126 = arith.index_cast %c4_i32 : i32 to index
    %c0_49 = arith.constant 0 : index
    %c0_50 = arith.constant 0 : index
    %127 = vector.load %arg0[%126, %c0_49, %c0_50] : memref<8x8x32xf32, #tpu.memory_space<vmem>>, vector<1x8x32xf32>
    %128 = vector.shape_cast %127 : vector<1x8x32xf32> to vector<8x32xf32>
    %129 = arith.addf %128, %125 : vector<8x32xf32>
    %130 = math.tanh %129 : vector<8x32xf32>
    %cst_51 = arith.constant dense<0.000000e+00> : vector<32x32xf32>
    %131 = tpu.matmul %3, %130, %cst_51 {dimension_numbers = #tpu.dot_dimension_numbers<[1], [0], [0], [1], [0, 0, 1, 1], [], []>} : vector<32x8xf32>, vector<8x32xf32>, vector<32x32xf32> -> vector<32x32xf32>
    %132 = vector.broadcast %1 : f32 to vector<32x32xf32>
    %133 = arith.mulf %132, %107 : vector<32x32xf32>
    %134 = vector.broadcast %0 : f32 to vector<32x32xf32>
    %135 = arith.mulf %134, %131 : vector<32x32xf32>
    %136 = arith.addf %133, %135 : vector<32x32xf32>
    %cst_52 = arith.constant dense<0.000000e+00> : vector<8x16xf32>
    %137 = tpu.matmul %130, %5, %cst_52 {dimension_numbers = #tpu.dot_dimension_numbers<[1], [0], [0], [1], [0, 0, 1, 1], [], []>} : vector<8x32xf32>, vector<32x16xf32>, vector<8x16xf32> -> vector<8x16xf32>
    %138 = vector.broadcast %6 : vector<1x16xf32> to vector<8x16xf32>
    %139 = arith.addf %137, %138 : vector<8x16xf32>
    %cst_53 = arith.constant dense<0xFF800000> : vector<8xf32>
    %140 = vector.multi_reduction <maximumf>, %139, %cst_53 [1] : vector<8x16xf32> to vector<8xf32>
    %141 = vector.shape_cast %140 : vector<8xf32> to vector<8x1xf32>
    %142 = vector.broadcast %141 : vector<8x1xf32> to vector<8x16xf32>
    %143 = arith.subf %139, %142 : vector<8x16xf32>
    %144 = math.exp %143 : vector<8x16xf32>
    %cst_54 = arith.constant dense<0.000000e+00> : vector<8xf32>
    %145 = vector.multi_reduction <add>, %144, %cst_54 [1] : vector<8x16xf32> to vector<8xf32>
    %146 = vector.shape_cast %145 : vector<8xf32> to vector<8x1xf32>
    %147 = vector.broadcast %146 : vector<8x1xf32> to vector<8x16xf32>
    %148 = arith.divf %144, %147 : vector<8x16xf32>
    %149 = arith.index_cast %c4_i32 : i32 to index
    %c0_55 = arith.constant 0 : index
    %c0_56 = arith.constant 0 : index
    %150 = vector.load %arg8[%149, %c0_55, %c0_56] : memref<8x8x16xf32, #tpu.memory_space<vmem>>, vector<1x8x16xf32>
    %151 = vector.shape_cast %150 : vector<1x8x16xf32> to vector<8x16xf32>
    %152 = vector.shape_cast %148 : vector<8x16xf32> to vector<1x8x16xf32>
    tpu.vector_store %arg8[%149, %c0_55, %c0_56], %152 {strides = array<i32>} : memref<8x8x16xf32, #tpu.memory_space<vmem>>, vector<1x8x16xf32>,
    %c5_i32 = arith.constant 5 : i32
    %153 = arith.mulf %4, %136 : vector<32x32xf32>
    %cst_57 = arith.constant dense<0.000000e+00> : vector<8x32xf32>
    %154 = tpu.matmul %2, %153, %cst_57 {dimension_numbers = #tpu.dot_dimension_numbers<[1], [0], [0], [1], [0, 0, 1, 1], [], []>} : vector<8x32xf32>, vector<32x32xf32>, vector<8x32xf32> -> vector<8x32xf32>
    %155 = arith.index_cast %c5_i32 : i32 to index
    %c0_58 = arith.constant 0 : index
    %c0_59 = arith.constant 0 : index
    %156 = vector.load %arg0[%155, %c0_58, %c0_59] : memref<8x8x32xf32, #tpu.memory_space<vmem>>, vector<1x8x32xf32>
    %157 = vector.shape_cast %156 : vector<1x8x32xf32> to vector<8x32xf32>
    %158 = arith.addf %157, %154 : vector<8x32xf32>
    %159 = math.tanh %158 : vector<8x32xf32>
    %cst_60 = arith.constant dense<0.000000e+00> : vector<32x32xf32>
    %160 = tpu.matmul %3, %159, %cst_60 {dimension_numbers = #tpu.dot_dimension_numbers<[1], [0], [0], [1], [0, 0, 1, 1], [], []>} : vector<32x8xf32>, vector<8x32xf32>, vector<32x32xf32> -> vector<32x32xf32>
    %161 = vector.broadcast %1 : f32 to vector<32x32xf32>
    %162 = arith.mulf %161, %136 : vector<32x32xf32>
    %163 = vector.broadcast %0 : f32 to vector<32x32xf32>
    %164 = arith.mulf %163, %160 : vector<32x32xf32>
    %165 = arith.addf %162, %164 : vector<32x32xf32>
    %cst_61 = arith.constant dense<0.000000e+00> : vector<8x16xf32>
    %166 = tpu.matmul %159, %5, %cst_61 {dimension_numbers = #tpu.dot_dimension_numbers<[1], [0], [0], [1], [0, 0, 1, 1], [], []>} : vector<8x32xf32>, vector<32x16xf32>, vector<8x16xf32> -> vector<8x16xf32>
    %167 = vector.broadcast %6 : vector<1x16xf32> to vector<8x16xf32>
    %168 = arith.addf %166, %167 : vector<8x16xf32>
    %cst_62 = arith.constant dense<0xFF800000> : vector<8xf32>
    %169 = vector.multi_reduction <maximumf>, %168, %cst_62 [1] : vector<8x16xf32> to vector<8xf32>
    %170 = vector.shape_cast %169 : vector<8xf32> to vector<8x1xf32>
    %171 = vector.broadcast %170 : vector<8x1xf32> to vector<8x16xf32>
    %172 = arith.subf %168, %171 : vector<8x16xf32>
    %173 = math.exp %172 : vector<8x16xf32>
    %cst_63 = arith.constant dense<0.000000e+00> : vector<8xf32>
    %174 = vector.multi_reduction <add>, %173, %cst_63 [1] : vector<8x16xf32> to vector<8xf32>
    %175 = vector.shape_cast %174 : vector<8xf32> to vector<8x1xf32>
    %176 = vector.broadcast %175 : vector<8x1xf32> to vector<8x16xf32>
    %177 = arith.divf %173, %176 : vector<8x16xf32>
    %178 = arith.index_cast %c5_i32 : i32 to index
    %c0_64 = arith.constant 0 : index
    %c0_65 = arith.constant 0 : index
    %179 = vector.load %arg8[%178, %c0_64, %c0_65] : memref<8x8x16xf32, #tpu.memory_space<vmem>>, vector<1x8x16xf32>
    %180 = vector.shape_cast %179 : vector<1x8x16xf32> to vector<8x16xf32>
    %181 = vector.shape_cast %177 : vector<8x16xf32> to vector<1x8x16xf32>
    tpu.vector_store %arg8[%178, %c0_64, %c0_65], %181 {strides = array<i32>} : memref<8x8x16xf32, #tpu.memory_space<vmem>>, vector<1x8x16xf32>,
    %c6_i32 = arith.constant 6 : i32
    %182 = arith.mulf %4, %165 : vector<32x32xf32>
    %cst_66 = arith.constant dense<0.000000e+00> : vector<8x32xf32>
    %183 = tpu.matmul %2, %182, %cst_66 {dimension_numbers = #tpu.dot_dimension_numbers<[1], [0], [0], [1], [0, 0, 1, 1], [], []>} : vector<8x32xf32>, vector<32x32xf32>, vector<8x32xf32> -> vector<8x32xf32>
    %184 = arith.index_cast %c6_i32 : i32 to index
    %c0_67 = arith.constant 0 : index
    %c0_68 = arith.constant 0 : index
    %185 = vector.load %arg0[%184, %c0_67, %c0_68] : memref<8x8x32xf32, #tpu.memory_space<vmem>>, vector<1x8x32xf32>
    %186 = vector.shape_cast %185 : vector<1x8x32xf32> to vector<8x32xf32>
    %187 = arith.addf %186, %183 : vector<8x32xf32>
    %188 = math.tanh %187 : vector<8x32xf32>
    %cst_69 = arith.constant dense<0.000000e+00> : vector<32x32xf32>
    %189 = tpu.matmul %3, %188, %cst_69 {dimension_numbers = #tpu.dot_dimension_numbers<[1], [0], [0], [1], [0, 0, 1, 1], [], []>} : vector<32x8xf32>, vector<8x32xf32>, vector<32x32xf32> -> vector<32x32xf32>
    %190 = vector.broadcast %1 : f32 to vector<32x32xf32>
    %191 = arith.mulf %190, %165 : vector<32x32xf32>
    %192 = vector.broadcast %0 : f32 to vector<32x32xf32>
    %193 = arith.mulf %192, %189 : vector<32x32xf32>
    %194 = arith.addf %191, %193 : vector<32x32xf32>
    %cst_70 = arith.constant dense<0.000000e+00> : vector<8x16xf32>
    %195 = tpu.matmul %188, %5, %cst_70 {dimension_numbers = #tpu.dot_dimension_numbers<[1], [0], [0], [1], [0, 0, 1, 1], [], []>} : vector<8x32xf32>, vector<32x16xf32>, vector<8x16xf32> -> vector<8x16xf32>
    %196 = vector.broadcast %6 : vector<1x16xf32> to vector<8x16xf32>
    %197 = arith.addf %195, %196 : vector<8x16xf32>
    %cst_71 = arith.constant dense<0xFF800000> : vector<8xf32>
    %198 = vector.multi_reduction <maximumf>, %197, %cst_71 [1] : vector<8x16xf32> to vector<8xf32>
    %199 = vector.shape_cast %198 : vector<8xf32> to vector<8x1xf32>
    %200 = vector.broadcast %199 : vector<8x1xf32> to vector<8x16xf32>
    %201 = arith.subf %197, %200 : vector<8x16xf32>
    %202 = math.exp %201 : vector<8x16xf32>
    %cst_72 = arith.constant dense<0.000000e+00> : vector<8xf32>
    %203 = vector.multi_reduction <add>, %202, %cst_72 [1] : vector<8x16xf32> to vector<8xf32>
    %204 = vector.shape_cast %203 : vector<8xf32> to vector<8x1xf32>
    %205 = vector.broadcast %204 : vector<8x1xf32> to vector<8x16xf32>
    %206 = arith.divf %202, %205 : vector<8x16xf32>
    %207 = arith.index_cast %c6_i32 : i32 to index
    %c0_73 = arith.constant 0 : index
    %c0_74 = arith.constant 0 : index
    %208 = vector.load %arg8[%207, %c0_73, %c0_74] : memref<8x8x16xf32, #tpu.memory_space<vmem>>, vector<1x8x16xf32>
    %209 = vector.shape_cast %208 : vector<1x8x16xf32> to vector<8x16xf32>
    %210 = vector.shape_cast %206 : vector<8x16xf32> to vector<1x8x16xf32>
    tpu.vector_store %arg8[%207, %c0_73, %c0_74], %210 {strides = array<i32>} : memref<8x8x16xf32, #tpu.memory_space<vmem>>, vector<1x8x16xf32>,
    %c7_i32 = arith.constant 7 : i32
    %211 = arith.mulf %4, %194 : vector<32x32xf32>
    %cst_75 = arith.constant dense<0.000000e+00> : vector<8x32xf32>
    %212 = tpu.matmul %2, %211, %cst_75 {dimension_numbers = #tpu.dot_dimension_numbers<[1], [0], [0], [1], [0, 0, 1, 1], [], []>} : vector<8x32xf32>, vector<32x32xf32>, vector<8x32xf32> -> vector<8x32xf32>
    %213 = arith.index_cast %c7_i32 : i32 to index
    %c0_76 = arith.constant 0 : index
    %c0_77 = arith.constant 0 : index
    %214 = vector.load %arg0[%213, %c0_76, %c0_77] : memref<8x8x32xf32, #tpu.memory_space<vmem>>, vector<1x8x32xf32>
    %215 = vector.shape_cast %214 : vector<1x8x32xf32> to vector<8x32xf32>
    %216 = arith.addf %215, %212 : vector<8x32xf32>
    %217 = math.tanh %216 : vector<8x32xf32>
    %cst_78 = arith.constant dense<0.000000e+00> : vector<32x32xf32>
    %218 = tpu.matmul %3, %217, %cst_78 {dimension_numbers = #tpu.dot_dimension_numbers<[1], [0], [0], [1], [0, 0, 1, 1], [], []>} : vector<32x8xf32>, vector<8x32xf32>, vector<32x32xf32> -> vector<32x32xf32>
    %219 = vector.broadcast %1 : f32 to vector<32x32xf32>
    %220 = arith.mulf %219, %194 : vector<32x32xf32>
    %221 = vector.broadcast %0 : f32 to vector<32x32xf32>
    %222 = arith.mulf %221, %218 : vector<32x32xf32>
    %223 = arith.addf %220, %222 : vector<32x32xf32>
    %cst_79 = arith.constant dense<0.000000e+00> : vector<8x16xf32>
    %224 = tpu.matmul %217, %5, %cst_79 {dimension_numbers = #tpu.dot_dimension_numbers<[1], [0], [0], [1], [0, 0, 1, 1], [], []>} : vector<8x32xf32>, vector<32x16xf32>, vector<8x16xf32> -> vector<8x16xf32>
    %225 = vector.broadcast %6 : vector<1x16xf32> to vector<8x16xf32>
    %226 = arith.addf %224, %225 : vector<8x16xf32>
    %cst_80 = arith.constant dense<0xFF800000> : vector<8xf32>
    %227 = vector.multi_reduction <maximumf>, %226, %cst_80 [1] : vector<8x16xf32> to vector<8xf32>
    %228 = vector.shape_cast %227 : vector<8xf32> to vector<8x1xf32>
    %229 = vector.broadcast %228 : vector<8x1xf32> to vector<8x16xf32>
    %230 = arith.subf %226, %229 : vector<8x16xf32>
    %231 = math.exp %230 : vector<8x16xf32>
    %cst_81 = arith.constant dense<0.000000e+00> : vector<8xf32>
    %232 = vector.multi_reduction <add>, %231, %cst_81 [1] : vector<8x16xf32> to vector<8xf32>
    %233 = vector.shape_cast %232 : vector<8xf32> to vector<8x1xf32>
    %234 = vector.broadcast %233 : vector<8x1xf32> to vector<8x16xf32>
    %235 = arith.divf %231, %234 : vector<8x16xf32>
    %236 = arith.index_cast %c7_i32 : i32 to index
    %c0_82 = arith.constant 0 : index
    %c0_83 = arith.constant 0 : index
    %237 = vector.load %arg8[%236, %c0_82, %c0_83] : memref<8x8x16xf32, #tpu.memory_space<vmem>>, vector<1x8x16xf32>
    %238 = vector.shape_cast %237 : vector<1x8x16xf32> to vector<8x16xf32>
    %239 = vector.shape_cast %235 : vector<8x16xf32> to vector<1x8x16xf32>
    tpu.vector_store %arg8[%236, %c0_82, %c0_83], %239 {strides = array<i32>} : memref<8x8x16xf32, #tpu.memory_space<vmem>>, vector<1x8x16xf32>,
    %c8_i32 = arith.constant 8 : i32
    %c0_84 = arith.constant 0 : index
    %c0_85 = arith.constant 0 : index
    %240 = vector.load %arg9[%c0_84, %c0_85] : memref<32x32xf32, #tpu.memory_space<vmem>>, vector<32x32xf32>
    tpu.vector_store %arg9[%c0_84, %c0_85], %223 {strides = array<i32>} : memref<32x32xf32, #tpu.memory_space<vmem>>, vector<32x32xf32>,
    return
  }
}

</mosaic_0001>

<bundles_post_ra>
// kernel: plasticnet_forward_seq.1
= control target key start
LH: loop header
LB: loop body
LE: loop exit
PB: predicated region body
PF: predicated region fallthrough
CT: control target
= control target key end

     0   :  { %16 = vsyncpa [#allocation4], 0  ;;  %v2716_v3 = vmov 0.0   ;;  %vm2717_vm0 = vmmov 0   ;;  %s3309_s0 = inlined_call_operand.vmem [shape: f32[8,8,32], index: 0, kind: input, shape index: {}]   ;;  %s3310_s1 = inlined_call_operand.vmem [shape: f32[8,32], index: 1, kind: input, shape index: {}]   ;;  %s3311_s2 = inlined_call_operand.vmem [shape: f32[32,8], index: 2, kind: input, shape index: {}]   ;;  %s3312_s3 = inlined_call_operand.vmem [shape: f32[32,32], index: 3, kind: input, shape index: {}]   ;;  %s3313_s4 = inlined_call_operand.vmem [shape: f32[32,32], index: 4, kind: input, shape index: {}]   ;;  %s3314_s5 = inlined_call_operand.vmem [shape: f32[32,16], index: 5, kind: input, shape index: {}]   ;;  %s3315_s6 = inlined_call_operand.vmem [shape: f32[1,16], index: 6, kind: input, shape index: {}]   ;;  %s3316_s7 = inlined_call_operand.<no memory space> [shape: f32[1], index: 7, kind: input, shape index: {}]   ;;  %s3317_s8 = inlined_call_operand.hbm [shape: f32[8,8,16], index: 8, kind: output, shape index: {0}]   ;;  %s3318_s9 = inlined_call_operand.hbm [shape: f32[32,32], index: 9, kind: output, shape index: {1}]  }
   0x1   :  { %v2775_v0 = vld [vmem:[%s3313_s4 + $0x18] sm:$0xff]  ;;  %v2785_v2 = vld [vmem:[%s3313_s4 + $0x10] sm:$0xff]  ;;  %2378 = vmatprep.subr.mxu0 %v2716_v3  ;;  %v2798_v6 = vld [vmem:[%s3313_s4 + $0x8] sm:$0xff]  ;;  %2386 = vmatprep.mubr.msk.f32.mxu0 %vm2717_vm0, %v2716_v3 }
   0x2   :  { %v2780_v1 = vld [vmem:[%s3312_s3 + $0x18] sm:$0xff]  ;;  %v2793_v5 = vld [vmem:[%s3312_s3 + $0x10] sm:$0xff]  ;;  %v51_v7 = vld [vmem:[%s3312_s3 + $0x8] sm:$0xff] }
   0x3   :  { %v57_v4 = vmul.f32 %v2780_v1, %v2775_v0  ;;  %v56_v8 = vmul.f32 %v2793_v5, %v2785_v2  ;;  %v2810_v9 = vld [vmem:[%s3313_s4] sm:$0xff]  ;;  %v55_v11 = vmul.f32 %v51_v7, %v2798_v6 }
   0x4   :  { %v50_v10 = vld [vmem:[%s3312_s3] sm:$0xff] }
   0x5   :  { %2379 = vmatpush3.msra.mxu0 %v57_v4 }
   0x6   :  { %17 = vsyncpa [#allocation6], 0  ;;  %2380 = vmatprep.subr.mxu0 %v2716_v3  ;;  %v54_v12 = vmul.f32 %v50_v10, %v2810_v9  ;;  %v2822_v13 = vld [vmem:[%s3310_s1] sm:$0xff]  ;;  %vm58_vm1 = vcmask 261120   ;;  %vm135_vm2 = vcmask 64512   ;;  %v2843_v20 = vld [vmem:[%s3311_s2 + $0x8] sm:$0xff]  ;;  %v2902_v29 = vstv %s3316_s7 }
   0x7   :  { %2381 = vmatpush3.msra.mxu0 %v56_v8  ;;  %v2833_v14 = vld [vmem:[%s3311_s2] sm:$0xff]  ;;  %v2848_v21 = vld [vmem:[%s3314_s5 + $0x18] sm:$0xff]  ;;  %v2853_v22 = vld [vmem:[%s3311_s2 + $0x10] sm:$0xff]  ;;  %s35_s22 = ssub.f32 1.0, %s3316_s7  ;;  %vm326_vm3 = vcmask 130048  }
   0x8   :  { %2382 = vmatprep.subr.mxu0 %v2716_v3  ;;  %2391 = vmatprep.mubr.msk.f32.mxu1 %vm135_vm2, %v2833_v14  ;;  %v132_v15 = vld [vmem:[%s3309_s0] sm:$0xff]  ;;  %v2861_v23 = vld [vmem:[%s3314_s5 + $0x10] sm:$0xff]  ;;  %v2869_v24 = vld [vmem:[%s3311_s2 + $0x18] sm:$0xff] }
   0x9   :  { %2383 = vmatpush3.msra.mxu0 %v55_v11  ;;  %v2875_v25 = vld [vmem:[%s3314_s5 + $0x8] sm:$0xff]  ;;  %v2884_v26 = vld [vmem:[%s3314_s5] sm:$0xff]  ;;  %v2897_v28 = vstv %s35_s22 }
   0xa   :  { %2384 = vmatprep.subr.mxu0 %v2716_v3  ;;  %v237_v31 = vmul.f32 %v2897_v28, %v2780_v1  ;;  %v235_v33 = vmul.f32 %v2897_v28, %v51_v7  ;;  %v236_v36 = vmul.f32 %v2897_v28, %v2793_v5  ;;  %v2914_v38 = vld [vmem:[%s3315_s6] ss:$0 sm:$0xff]  ;;  %v234_v39 = vmul.f32 %v2897_v28, %v50_v10  ;;  %v2210_v54 = vld [vmem:[%s3309_s0 + $0x8] sm:$0xff] }
   0xb   :  { %2385 = vmatpush3.msra.mxu0 %v54_v12 }
   0xc   :  { %2387 = vmatmul.mubr.msk.f32.vlgmr.msra.gmra.mxu0 %vm58_vm1, %v2822_v13  ;;  %2408 = vmatprep.subr.mxu0 %v2716_v3 }
   0xd   :  { %2416 = vmatprep.mubr.msk.f32.mxu0 %vm2717_vm0, %v2716_v3 }
  0xcc   :  { %v128_v16 = vpop.f32.mrf.mxu0 }
  0xcd   :  { %v133_v17 = vadd.f32 %v132_v15, %v128_v16 }
  0xce   :  { %v2388_v18 = vpop.f32.mrf.mxu0 }
  0xcf   :  { %2624 = vtanh.f32 %v133_v17 }
  0xdc   :  { %v2625_v19 = vpop.eup %2624 }
  0xdd   :  { %2389 = vmatprep.subr.mxu1 %v2625_v19 }
  0xde   :  { %2390 = vmatpush3.msra.mxu1 %v2625_v19 }
  0xdf   :  { %2392 = vmatmul.mubr.msk.f32.vlgmr.msra.gmra.mxu1 %vm135_vm2, %v2843_v20  ;;  %2397 = vmatprep.subr.mxu1 %v2716_v3 }
  0xe0   :  { %2398 = vmatpush3.msra.mxu1 %v2848_v21  ;;  %2394 = vmatprep.mubr.msk.f32.mxu1 %vm135_vm2, %v2853_v22 }
  0xe1   :  { %2399 = vmatprep.subr.mxu1 %v2716_v3 }
  0xe2   :  { %2400 = vmatpush3.msra.mxu1 %v2861_v23 }
  0xe3   :  { %2395 = vmatmul.mubr.msk.f32.gmra.mxu1 %vm135_vm2, %v2869_v24  ;;  %2401 = vmatprep.subr.mxu1 %v2716_v3 }
  0xe4   :  { %2402 = vmatpush3.msra.mxu1 %v2875_v25  ;;  %2405 = vmatprep.mubr.msk.f32.mxu1 %vm2717_vm0, %v2716_v3 }
  0xe5   :  { %2403 = vmatprep.subr.mxu1 %v2716_v3 }
  0xe6   :  { %2404 = vmatpush3.msra.mxu1 %v2884_v26 }
  0xe7   :  { %2406 = vmatmul.mubr.msk.f32.vlgmr.msra.gmra.mxu1 %vm58_vm1, %v2625_v19 }
  0xe8   :  { %2421 = vmatprep.mubr.msk.f32.mxu1 %vm135_vm2, %v2833_v14 }
 0x19f   :  { %v2393_v27 = vpop.f32.mrf.mxu1 }
 0x1a0   :  { %v240_v34 = vmul.f32 %v2393_v27, %v2902_v29 }
 0x1a1   :  { %v214_v30 = vpop.f32.mrf.mxu1 }
 0x1a2   :  { %v239_v40 = vmul.f32 %v2902_v29, %v214_v30  ;;  %v244_v44 = vadd.f32 %v240_v34, %v235_v33 }
 0x1a3   :  { %v2396_v32 = vpop.f32.mrf.mxu1 }
 0x1a4   :  { %v242_v35 = vmul.f32 %v2396_v32, %v2902_v29  ;;  %v243_v49 = vadd.f32 %v239_v40, %v234_v39  ;;  %v340_v52 = vmul.f32 %v244_v44, %v2798_v6  ;;  %v503_v4 = vmul.f32 %v244_v44, %v2897_v28 }
 0x1a5   :  { %v224_v37 = vpop.f32.mrf.mxu1 }
 0x1a6   :  { %v246_v41 = vadd.f32 %v242_v35, %v237_v31  ;;  %v241_v42 = vmul.f32 %v2902_v29, %v224_v37  ;;  %v339_v53 = vmul.f32 %v243_v49, %v2810_v9  ;;  %v502_v12 = vmul.f32 %v243_v49, %v2897_v28  ;;  %v2217_v35 = vld [vmem:[%s3309_s0 + $0x10] sm:$0xff] }
 0x1a7   :  { %v322_v43 = vpop.f32.mrf.mxu1 }
 0x1a8   :  { %v342_v45 = vmul.f32 %v246_v41, %v2775_v0  ;;  %v245_v46 = vadd.f32 %v241_v42, %v236_v36  ;;  %v2921_v47 = vadd.f32 %v2914_v38, %v322_v43  ;;  %v505_v63 = vmul.f32 %v246_v41, %v2897_v28 }
 0x1a9   :  { %v2407_v48 = vpop.f32.mrf.mxu1 }
 0x1aa   :  { %v341_v50 = vmul.f32 %v245_v46, %v2785_v2  ;;  %2409 = vmatpush3.msra.mxu0 %v342_v45  ;;  %v327_v51 = vsel %vm326_vm3, %v2921_v47, -inf  ;;  %v504_v10 = vmul.f32 %v245_v46, %v2897_v28 }
 0x1ab   :  { %328 = vmax.xlane.f32.xlu0 %v327_v51  ;;  %2410 = vmatprep.subr.mxu0 %v2716_v3 }
 0x1ac   :  { %2411 = vmatpush3.msra.mxu0 %v341_v50 }
 0x1ad   :  { %2412 = vmatprep.subr.mxu0 %v2716_v3 }
 0x1ae   :  { %2413 = vmatpush3.msra.mxu0 %v340_v52 }
 0x1af   :  { %2414 = vmatprep.subr.mxu0 %v2716_v3 }
 0x1b0   :  { %2415 = vmatpush3.msra.mxu0 %v339_v53 }
 0x1b1   :  { %2417 = vmatmul.mubr.msk.f32.vlgmr.msra.gmra.mxu0 %vm58_vm1, %v2822_v13  ;;  %2438 = vmatprep.subr.mxu0 %v2716_v3 }
 0x1b2   :  { %2446 = vmatprep.mubr.msk.f32.mxu0 %vm2717_vm0, %v2716_v3 }
 0x271   :  { %v409_v55 = vpop.f32.mrf.mxu0 }
 0x272   :  { %v415_v56 = vadd.f32 %v2210_v54, %v409_v55 }
 0x273   :  { %v2418_v57 = vpop.f32.mrf.mxu0 }
 0x274   :  { %2626 = vtanh.f32 %v415_v56 }
 0x281   :  { %v2627_v58 = vpop.eup %2626 }
 0x282   :  { %2419 = vmatprep.subr.mxu1 %v2627_v58 }
 0x283   :  { %2420 = vmatpush3.msra.mxu1 %v2627_v58 }
 0x284   :  { %2422 = vmatmul.mubr.msk.f32.vlgmr.msra.gmra.mxu1 %vm135_vm2, %v2843_v20  ;;  %2427 = vmatprep.subr.mxu1 %v2716_v3 }
 0x285   :  { %2428 = vmatpush3.msra.mxu1 %v2848_v21  ;;  %2424 = vmatprep.mubr.msk.f32.mxu1 %vm135_vm2, %v2853_v22 }
 0x286   :  { %2429 = vmatprep.subr.mxu1 %v2716_v3 }
 0x287   :  { %2430 = vmatpush3.msra.mxu1 %v2861_v23 }
 0x288   :  { %2425 = vmatmul.mubr.msk.f32.gmra.mxu1 %vm135_vm2, %v2869_v24  ;;  %2431 = vmatprep.subr.mxu1 %v2716_v3 }
 0x289   :  { %2432 = vmatpush3.msra.mxu1 %v2875_v25  ;;  %2435 = vmatprep.mubr.msk.f32.mxu1 %vm2717_vm0, %v2716_v3 }
 0x28a   :  { %2433 = vmatprep.subr.mxu1 %v2716_v3 }
 0x28b   :  { %2434 = vmatpush3.msra.mxu1 %v2884_v26 }
 0x28c   :  { %2436 = vmatmul.mubr.msk.f32.vlgmr.msra.gmra.mxu1 %vm58_vm1, %v2627_v58 }
 0x28d   :  { %2451 = vmatprep.mubr.msk.f32.mxu1 %vm135_vm2, %v2833_v14 }
 0x344   :  { %v2423_v59 = vpop.f32.mrf.mxu1 }
 0x345   :  { %v507_v62 = vmul.f32 %v2423_v59, %v2902_v29 }
 0x346   :  { %v483_v60 = vpop.f32.mrf.mxu1 }
 0x347   :  { %v506_v7 = vmul.f32 %v483_v60, %v2902_v29  ;;  %v511_v16 = vadd.f32 %v507_v62, %v503_v4 }
 0x348   :  { %v2426_v61 = vpop.f32.mrf.mxu1 }
 0x349   :  { %v509_v1 = vmul.f32 %v2426_v61, %v2902_v29  ;;  %v510_v30 = vadd.f32 %v506_v7, %v502_v12  ;;  %v601_v33 = vmul.f32 %v511_v16, %v2798_v6  ;;  %v764_v52 = vmul.f32 %v511_v16, %v2897_v28 }
 0x34a   :  { %v493_v5 = vpop.f32.mrf.mxu1 }
 0x34b   :  { %v513_v8 = vadd.f32 %v509_v1, %v505_v63  ;;  %v508_v11 = vmul.f32 %v493_v5, %v2902_v29  ;;  %v600_v34 = vmul.f32 %v510_v30, %v2810_v9  ;;  %v763_v59 = vmul.f32 %v510_v30, %v2897_v28  ;;  %v2224_v5 = vld [vmem:[%s3309_s0 + $0x18] sm:$0xff] }
 0x34c   :  { %v583_v15 = vpop.f32.mrf.mxu1 }
 0x34d   :  { %v603_v17 = vmul.f32 %v513_v8, %v2775_v0  ;;  %v512_v18 = vadd.f32 %v508_v11, %v504_v10  ;;  %v2968_v19 = vadd.f32 %v2914_v38, %v583_v15  ;;  %v766_v50 = vmul.f32 %v513_v8, %v2897_v28 }
 0x34e   :  { %v2437_v27 = vpop.f32.mrf.mxu1 }
 0x34f   :  { %v602_v31 = vmul.f32 %v512_v18, %v2785_v2  ;;  %2439 = vmatpush3.msra.mxu0 %v603_v17  ;;  %v587_v32 = vsel %vm326_vm3, %v2968_v19, -inf  ;;  %v765_v56 = vmul.f32 %v512_v18, %v2897_v28 }
 0x350   :  { %2440 = vmatprep.subr.mxu0 %v2716_v3  ;;  %588 = vmax.xlane.f32.xlu0 %v587_v32 }
 0x351   :  { %2441 = vmatpush3.msra.mxu0 %v602_v31 }
 0x352   :  { %2442 = vmatprep.subr.mxu0 %v2716_v3 }
 0x353   :  { %2443 = vmatpush3.msra.mxu0 %v601_v33 }
 0x354   :  { %2444 = vmatprep.subr.mxu0 %v2716_v3 }
 0x355   :  { %2445 = vmatpush3.msra.mxu0 %v600_v34 }
 0x356   :  { %2447 = vmatmul.mubr.msk.f32.vlgmr.msra.gmra.mxu0 %vm58_vm1, %v2822_v13  ;;  %2457 = vmatprep.subr.mxu0 %v2716_v3 }
 0x357   :  { %2458 = vmatpush3.msra.mxu0 %v2848_v21  ;;  %2465 = vmatprep.mubr.msk.f32.mxu0 %vm2717_vm0, %v2716_v3 }
 0x358   :  { %2459 = vmatprep.subr.mxu0 %v2716_v3 }
 0x359   :  { %2460 = vmatpush3.msra.mxu0 %v2861_v23 }
 0x35a   :  { %2461 = vmatprep.subr.mxu0 %v2716_v3 }
 0x35b   :  { %2462 = vmatpush3.msra.mxu0 %v2875_v25 }
 0x35c   :  { %2463 = vmatprep.subr.mxu0 %v2716_v3 }
 0x35d   :  { %2464 = vmatpush3.msra.mxu0 %v2884_v26 }
 0x416   :  { %v670_v36 = vpop.f32.mrf.mxu0 }
 0x417   :  { %v676_v37 = vadd.f32 %v2217_v35, %v670_v36 }
 0x418   :  { %v2448_v39 = vpop.f32.mrf.mxu0 }
 0x419   :  { %2628 = vtanh.f32 %v676_v37 }
 0x426   :  { %v2629_v40 = vpop.eup %2628 }
 0x427   :  { %2449 = vmatprep.subr.mxu1 %v2629_v40  ;;  %2466 = vmatmul.mubr.msk.f32.vlgmr.msra.gmra.mxu0 %vm58_vm1, %v2629_v40 }
 0x428   :  { %2450 = vmatpush3.msra.mxu1 %v2629_v40  ;;  %2481 = vmatprep.mubr.msk.f32.mxu0 %vm135_vm2, %v2833_v14 }
 0x429   :  { %2452 = vmatmul.mubr.msk.f32.vlgmr.msra.gmra.mxu1 %vm135_vm2, %v2843_v20  ;;  %2468 = vmatprep.subr.mxu1 %v2716_v3 }
 0x42a   :  { %2454 = vmatprep.mubr.msk.f32.mxu1 %vm135_vm2, %v2853_v22 }
 0x42d   :  { %2455 = vmatmul.mubr.msk.f32.gmra.mxu1 %vm135_vm2, %v2869_v24 }
 0x42e   :  { %2476 = vmatprep.mubr.msk.f32.mxu1 %vm2717_vm0, %v2716_v3 }
 0x4e7   :  { %v844_v41 = vpop.f32.mrf.mxu0 }
 0x4e8   :  { %v3006_v42 = vadd.f32 %v2914_v38, %v844_v41 }
 0x4e9   :  { %v2453_v43 = vpop.f32.mrf.mxu1  ;;  %v2467_v44 = vpop.f32.mrf.mxu0 }
 0x4ea   :  { %v848_v45 = vsel %vm326_vm3, %v3006_v42, -inf  ;;  %v768_v49 = vmul.f32 %v2453_v43, %v2902_v29 }
 0x4eb   :  { %v744_v46 = vpop.f32.mrf.mxu1  ;;  %849 = vmax.xlane.f32.xlu1 %v848_v45 }
 0x4ec   :  { %v767_v54 = vmul.f32 %v744_v46, %v2902_v29  ;;  %v772_v58 = vadd.f32 %v768_v49, %v764_v52 }
 0x4ed   :  { %v2456_v48 = vpop.f32.mrf.mxu1 }
 0x4ee   :  { %v770_v51 = vmul.f32 %v2456_v48, %v2902_v29  ;;  %v771_v62 = vadd.f32 %v767_v54, %v763_v59  ;;  %v862_v1 = vmul.f32 %v772_v58, %v2798_v6  ;;  %v1025_v34 = vmul.f32 %v772_v58, %v2897_v28 }
 0x4ef   :  { %v754_v53 = vpop.f32.mrf.mxu1 }
 0x4f0   :  { %v774_v55 = vadd.f32 %v770_v51, %v766_v50  ;;  %v769_v57 = vmul.f32 %v754_v53, %v2902_v29  ;;  %v861_v4 = vmul.f32 %v771_v62, %v2810_v9  ;;  %v1024_v43 = vmul.f32 %v771_v62, %v2897_v28  ;;  %v2231_v51 = vld [vmem:[%s3309_s0 + $0x20] sm:$0xff] }
 0x4f2   :  { %v864_v60 = vmul.f32 %v774_v55, %v2775_v0  ;;  %v773_v61 = vadd.f32 %v769_v57, %v765_v56  ;;  %v1027_v32 = vmul.f32 %v774_v55, %v2897_v28 }
 0x4f4   :  { %v863_v63 = vmul.f32 %v773_v61, %v2785_v2  ;;  %2469 = vmatpush3.msra.mxu1 %v864_v60  ;;  %v1026_v39 = vmul.f32 %v773_v61, %v2897_v28 }
 0x4f5   :  { %2470 = vmatprep.subr.mxu1 %v2716_v3 }
 0x4f6   :  { %2471 = vmatpush3.msra.mxu1 %v863_v63 }
 0x4f7   :  { %2472 = vmatprep.subr.mxu1 %v2716_v3 }
 0x4f8   :  { %2473 = vmatpush3.msra.mxu1 %v862_v1 }
 0x4f9   :  { %2474 = vmatprep.subr.mxu1 %v2716_v3 }
 0x4fa   :  { %2475 = vmatpush3.msra.mxu1 %v861_v4 }
 0x4fb   :  { %2477 = vmatmul.mubr.msk.f32.vlgmr.msra.gmra.mxu1 %vm58_vm1, %v2822_v13  ;;  %2487 = vmatprep.subr.mxu1 %v2716_v3 }
 0x4fc   :  { %2488 = vmatpush3.msra.mxu1 %v2848_v21  ;;  %2495 = vmatprep.mubr.msk.f32.mxu1 %vm2717_vm0, %v2716_v3 }
 0x4fd   :  { %2489 = vmatprep.subr.mxu1 %v2716_v3 }
 0x4fe   :  { %2490 = vmatpush3.msra.mxu1 %v2861_v23 }
 0x4ff   :  { %2491 = vmatprep.subr.mxu1 %v2716_v3 }
 0x500   :  { %2492 = vmatpush3.msra.mxu1 %v2875_v25 }
 0x501   :  { %2493 = vmatprep.subr.mxu1 %v2716_v3 }
 0x502   :  { %2494 = vmatpush3.msra.mxu1 %v2884_v26 }
 0x5bb   :  { %v931_v7 = vpop.f32.mrf.mxu1 }
 0x5bc   :  { %v937_v8 = vadd.f32 %v2224_v5, %v931_v7 }
 0x5bd   :  { %v2478_v10 = vpop.f32.mrf.mxu1 }
 0x5be   :  { %2630 = vtanh.f32 %v937_v8 }
 0x5cb   :  { %v2631_v11 = vpop.eup %2630 }
 0x5cc   :  { %2479 = vmatprep.subr.mxu0 %v2631_v11  ;;  %2496 = vmatmul.mubr.msk.f32.vlgmr.msra.gmra.mxu1 %vm58_vm1, %v2631_v11 }
 0x5cd   :  { %2480 = vmatpush3.msra.mxu0 %v2631_v11  ;;  %2511 = vmatprep.mubr.msk.f32.mxu1 %vm135_vm2, %v2833_v14 }
 0x5ce   :  { %2482 = vmatmul.mubr.msk.f32.vlgmr.msra.gmra.mxu0 %vm135_vm2, %v2843_v20  ;;  %2498 = vmatprep.subr.mxu0 %v2716_v3 }
 0x5cf   :  { %2484 = vmatprep.mubr.msk.f32.mxu0 %vm135_vm2, %v2853_v22 }
 0x5d2   :  { %2485 = vmatmul.mubr.msk.f32.gmra.mxu0 %vm135_vm2, %v2869_v24 }
 0x5d3   :  { %2506 = vmatprep.mubr.msk.f32.mxu0 %vm2717_vm0, %v2716_v3 }
 0x68c   :  { %v1105_v12 = vpop.f32.mrf.mxu1 }
 0x68d   :  { %v3053_v15 = vadd.f32 %v2914_v38, %v1105_v12 }
 0x68e   :  { %v2483_v16 = vpop.f32.mrf.mxu0  ;;  %v2497_v17 = vpop.f32.mrf.mxu1 }
 0x68f   :  { %v1109_v18 = vsel %vm326_vm3, %v3053_v15, -inf  ;;  %v1029_v31 = vmul.f32 %v2483_v16, %v2902_v29 }
 0x690   :  { %1110 = vmax.xlane.f32.xlu1 %v1109_v18  ;;  %v1005_v27 = vpop.f32.mrf.mxu0 }
 0x691   :  { %v1028_v36 = vmul.f32 %v1005_v27, %v2902_v29  ;;  %v1033_v41 = vadd.f32 %v1029_v31, %v1025_v34  ;;  %v2238_v34 = vld [vmem:[%s3309_s0 + $0x28] sm:$0xff] }
 0x692   :  { %v2486_v30 = vpop.f32.mrf.mxu0 }
 0x693   :  { %v1031_v33 = vmul.f32 %v2486_v30, %v2902_v29  ;;  %v1032_v46 = vadd.f32 %v1028_v36, %v1024_v43  ;;  %v1123_v49 = vmul.f32 %v1033_v41, %v2798_v6  ;;  %v1286_v5 = vmul.f32 %v1033_v41, %v2897_v28 }
 0x694   :  { %v1015_v35 = vpop.f32.mrf.mxu0 }
 0x695   :  { %v1035_v37 = vadd.f32 %v1031_v33, %v1027_v32  ;;  %v1030_v40 = vmul.f32 %v1015_v35, %v2902_v29  ;;  %v1122_v50 = vmul.f32 %v1032_v46, %v2810_v9  ;;  %v1285_v17 = vmul.f32 %v1032_v46, %v2897_v28 }
 0x697   :  { %v1125_v44 = vmul.f32 %v1035_v37, %v2775_v0  ;;  %v1034_v45 = vadd.f32 %v1030_v40, %v1026_v39  ;;  %v1288_v1 = vmul.f32 %v1035_v37, %v2897_v28 }
 0x699   :  { %v1124_v48 = vmul.f32 %v1034_v45, %v2785_v2  ;;  %2499 = vmatpush3.msra.mxu0 %v1125_v44  ;;  %v1287_v11 = vmul.f32 %v1034_v45, %v2897_v28 }
 0x69a   :  { %2500 = vmatprep.subr.mxu0 %v2716_v3 }
 0x69b   :  { %2501 = vmatpush3.msra.mxu0 %v1124_v48 }
 0x69c   :  { %2502 = vmatprep.subr.mxu0 %v2716_v3 }
 0x69d   :  { %2503 = vmatpush3.msra.mxu0 %v1123_v49 }
 0x69e   :  { %2504 = vmatprep.subr.mxu0 %v2716_v3 }
 0x69f   :  { %2505 = vmatpush3.msra.mxu0 %v1122_v50 }
 0x6a0   :  { %2507 = vmatmul.mubr.msk.f32.vlgmr.msra.gmra.mxu0 %vm58_vm1, %v2822_v13  ;;  %2517 = vmatprep.subr.mxu0 %v2716_v3 }
 0x6a1   :  { %2518 = vmatpush3.msra.mxu0 %v2848_v21  ;;  %2525 = vmatprep.mubr.msk.f32.mxu0 %vm2717_vm0, %v2716_v3 }
 0x6a2   :  { %2519 = vmatprep.subr.mxu0 %v2716_v3 }
 0x6a3   :  { %2520 = vmatpush3.msra.mxu0 %v2861_v23 }
 0x6a4   :  { %2521 = vmatprep.subr.mxu0 %v2716_v3 }
 0x6a5   :  { %2522 = vmatpush3.msra.mxu0 %v2875_v25 }
 0x6a6   :  { %2523 = vmatprep.subr.mxu0 %v2716_v3 }
 0x6a7   :  { %2524 = vmatpush3.msra.mxu0 %v2884_v26 }
 0x760   :  { %v1192_v52 = vpop.f32.mrf.mxu0 }
 0x761   :  { %v1198_v53 = vadd.f32 %v2231_v51, %v1192_v52 }
 0x762   :  { %v2508_v54 = vpop.f32.mrf.mxu0 }
 0x763   :  { %2632 = vtanh.f32 %v1198_v53 }
 0x770   :  { %v2633_v55 = vpop.eup %2632 }
 0x771   :  { %2509 = vmatprep.subr.mxu1 %v2633_v55  ;;  %2526 = vmatmul.mubr.msk.f32.vlgmr.msra.gmra.mxu0 %vm58_vm1, %v2633_v55 }
 0x772   :  { %2510 = vmatpush3.msra.mxu1 %v2633_v55  ;;  %2541 = vmatprep.mubr.msk.f32.mxu0 %vm135_vm2, %v2833_v14 }
 0x773   :  { %2512 = vmatmul.mubr.msk.f32.vlgmr.msra.gmra.mxu1 %vm135_vm2, %v2843_v20  ;;  %2528 = vmatprep.subr.mxu1 %v2716_v3 }
 0x774   :  { %2514 = vmatprep.mubr.msk.f32.mxu1 %vm135_vm2, %v2853_v22 }
 0x777   :  { %2515 = vmatmul.mubr.msk.f32.gmra.mxu1 %vm135_vm2, %v2869_v24 }
 0x778   :  { %2536 = vmatprep.mubr.msk.f32.mxu1 %vm2717_vm0, %v2716_v3 }
 0x831   :  { %v1366_v56 = vpop.f32.mrf.mxu0 }
 0x832   :  { %v3100_v57 = vadd.f32 %v2914_v38, %v1366_v56 }
 0x833   :  { %v2513_v58 = vpop.f32.mrf.mxu1  ;;  %v2527_v59 = vpop.f32.mrf.mxu0 }
 0x834   :  { %v1370_v60 = vsel %vm326_vm3, %v3100_v57, -inf  ;;  %v1290_v63 = vmul.f32 %v2513_v58, %v2902_v29 }
 0x835   :  { %v1266_v61 = vpop.f32.mrf.mxu1  ;;  %1371 = vmax.xlane.f32.xlu0 %v1370_v60 }
 0x836   :  { %v1289_v8 = vmul.f32 %v1266_v61, %v2902_v29  ;;  %v1294_v16 = vadd.f32 %v1290_v63, %v1286_v5 }
 0x837   :  { %v2516_v62 = vpop.f32.mrf.mxu1 }
 0x838   :  { %v1292_v4 = vmul.f32 %v2516_v62, %v2902_v29  ;;  %v1293_v30 = vadd.f32 %v1289_v8, %v1285_v17  ;;  %v1384_v32 = vmul.f32 %v1294_v16, %v2798_v6  ;;  %v1547_v52 = vmul.f32 %v1294_v16, %v2897_v28  ;;  %v329_v16 = vpop.xlane.xlu0 %328 }
 0x839   :  { %v1276_v7 = vpop.f32.mrf.mxu1  ;;  %v330_v17 = vsub.f32 %v2921_v47, %v329_v16 }
 0x83a   :  { %v1296_v10 = vadd.f32 %v1292_v4, %v1288_v1  ;;  %v1291_v12 = vmul.f32 %v1276_v7, %v2902_v29  ;;  %v1383_v33 = vmul.f32 %v1293_v30, %v2810_v9  ;;  %v1546_v60 = vmul.f32 %v1293_v30, %v2897_v28  ;;  %v2245_v7 = vld [vmem:[%s3309_s0 + $0x30] sm:$0xff] }
 0x83b   :  { %v331_v30 = vmul.f32 1.442695, %v330_v17 }
 0x83c   :  { %v1386_v18 = vmul.f32 %v1296_v10, %v2775_v0  ;;  %v1295_v27 = vadd.f32 %v1291_v12, %v1287_v11  ;;  %v1549_v50 = vmul.f32 %v1296_v10, %v2897_v28 }
 0x83e   :  { %v1385_v31 = vmul.f32 %v1295_v27, %v2785_v2  ;;  %2529 = vmatpush3.msra.mxu1 %v1386_v18  ;;  %v1548_v56 = vmul.f32 %v1295_v27, %v2897_v28  ;;  %v850_v18 = vpop.xlane.xlu1 %849  ;;  %v3206_v27 = vpop.xlane.xlu0 %588 }
 0x83f   :  { %2530 = vmatprep.subr.mxu1 %v2716_v3 }
 0x840   :  { %2531 = vmatpush3.msra.mxu1 %v1385_v31 }
 0x841   :  { %2532 = vmatprep.subr.mxu1 %v2716_v3 }
 0x842   :  { %2533 = vmatpush3.msra.mxu1 %v1384_v32 }
 0x843   :  { %2534 = vmatprep.subr.mxu1 %v2716_v3 }
 0x844   :  { %2535 = vmatpush3.msra.mxu1 %v1383_v33 }
 0x845   :  { %2537 = vmatmul.mubr.msk.f32.vlgmr.msra.gmra.mxu1 %vm58_vm1, %v2822_v13  ;;  %2547 = vmatprep.subr.mxu1 %v2716_v3 }
 0x846   :  { %2548 = vmatpush3.msra.mxu1 %v2848_v21  ;;  %2555 = vmatprep.mubr.msk.f32.mxu1 %vm2717_vm0, %v2716_v3 }
 0x847   :  { %2549 = vmatprep.subr.mxu1 %v2716_v3 }
 0x848   :  { %2550 = vmatpush3.msra.mxu1 %v2861_v23 }
 0x849   :  { %2551 = vmatprep.subr.mxu1 %v2716_v3 }
 0x84a   :  { %2552 = vmatpush3.msra.mxu1 %v2875_v25 }
 0x84b   :  { %2553 = vmatprep.subr.mxu1 %v2716_v3 }
 0x84c   :  { %2554 = vmatpush3.msra.mxu1 %v2884_v26 }
 0x8be   :  { %v1372_v31 = vpop.xlane.xlu0 %1371 }
 0x8bf   :  { %v1373_v33 = vsub.f32 %v3100_v57, %v1372_v31 }
 0x905   :  { %v1453_v35 = vpop.f32.mrf.mxu1 }
 0x906   :  { %v1459_v36 = vadd.f32 %v2238_v34, %v1453_v35  ;;  %v1374_v34 = vmul.f32 1.442695, %v1373_v33  ;;  %v590_v33 = vsub.f32 %v2968_v19, %v3206_v27 }
 0x907   :  { %v2538_v37 = vpop.f32.mrf.mxu1 }
 0x908   :  { %2634 = vtanh.f32 %v1459_v36 }
 0x915   :  { %v2635_v39 = vpop.eup %2634 }
 0x916   :  { %2539 = vmatprep.subr.mxu0 %v2635_v39  ;;  %2556 = vmatmul.mubr.msk.f32.vlgmr.msra.gmra.mxu1 %vm58_vm1, %v2635_v39 }
 0x917   :  { %2540 = vmatpush3.msra.mxu0 %v2635_v39  ;;  %2571 = vmatprep.mubr.msk.f32.mxu1 %vm135_vm2, %v2833_v14 }
 0x918   :  { %2542 = vmatmul.mubr.msk.f32.vlgmr.msra.gmra.mxu0 %vm135_vm2, %v2843_v20  ;;  %2558 = vmatprep.subr.mxu0 %v2716_v3 }
 0x919   :  { %2544 = vmatprep.mubr.msk.f32.mxu0 %vm135_vm2, %v2853_v22 }
 0x91c   :  { %2545 = vmatmul.mubr.msk.f32.gmra.mxu0 %vm135_vm2, %v2869_v24 }
 0x91d   :  { %2566 = vmatprep.mubr.msk.f32.mxu0 %vm2717_vm0, %v2716_v3 }
 0x9d6   :  { %v1627_v40 = vpop.f32.mrf.mxu1 }
 0x9d7   :  { %v3147_v41 = vadd.f32 %v2914_v38, %v1627_v40 }
 0x9d8   :  { %v2543_v43 = vpop.f32.mrf.mxu0  ;;  %v2557_v44 = vpop.f32.mrf.mxu1 }
 0x9d9   :  { %v1631_v45 = vsel %vm326_vm3, %v3147_v41, -inf  ;;  %v1551_v49 = vmul.f32 %v2543_v43, %v2902_v29 }
 0x9da   :  { %1632 = vmax.xlane.f32.xlu1 %v1631_v45  ;;  %v1527_v46 = vpop.f32.mrf.mxu0 }
 0x9db   :  { %v1550_v54 = vmul.f32 %v1527_v46, %v2902_v29  ;;  %v3160_v59 = vadd.f32 %v1551_v49, %v1547_v52 }
 0x9dc   :  { %v2546_v48 = vpop.f32.mrf.mxu0 }
 0x9dd   :  { %v1553_v51 = vmul.f32 %v2546_v48, %v2902_v29  ;;  %v3167_v63 = vadd.f32 %v1550_v54, %v1546_v60  ;;  %v1645_v4 = vmul.f32 %v3160_v59, %v2798_v6  ;;  %v1808_v49 = vmul.f32 %v3160_v59, %v2897_v28 }
 0x9de   :  { %v1537_v53 = vpop.f32.mrf.mxu0 }
 0x9df   :  { %v3156_v55 = vadd.f32 %v1553_v51, %v1549_v50  ;;  %v1552_v58 = vmul.f32 %v1537_v53, %v2902_v29  ;;  %v1644_v5 = vmul.f32 %v3167_v63, %v2810_v9 }
 0x9e1   :  { %v1647_v61 = vmul.f32 %v3156_v55, %v2775_v0  ;;  %v3165_v62 = vadd.f32 %v1552_v58, %v1548_v56  ;;  %v1810_v57 = vmul.f32 %v3156_v55, %v2897_v28  ;;  %v1807_v58 = vmul.f32 %v3167_v63, %v2897_v28 }
 0x9e3   :  { %v1646_v1 = vmul.f32 %v3165_v62, %v2785_v2  ;;  %2559 = vmatpush3.msra.mxu0 %v1647_v61  ;;  %v1809_v53 = vmul.f32 %v3165_v62, %v2897_v28 }
 0x9e4   :  { %2560 = vmatprep.subr.mxu0 %v2716_v3 }
 0x9e5   :  { %2561 = vmatpush3.msra.mxu0 %v1646_v1 }
 0x9e6   :  { %2562 = vmatprep.subr.mxu0 %v2716_v3 }
 0x9e7   :  { %2563 = vmatpush3.msra.mxu0 %v1645_v4 }
 0x9e8   :  { %2564 = vmatprep.subr.mxu0 %v2716_v3 }
 0x9e9   :  { %2565 = vmatpush3.msra.mxu0 %v1644_v5 }
 0x9ea   :  { %2567 = vmatmul.mubr.msk.f32.vlgmr.msra.gmra.mxu0 %vm58_vm1, %v2822_v13  ;;  %2577 = vmatprep.subr.mxu0 %v2716_v3 }
 0x9eb   :  { %2578 = vmatpush3.msra.mxu0 %v2848_v21  ;;  %2585 = vmatprep.mubr.msk.f32.mxu0 %vm2717_vm0, %v2716_v3 }
 0x9ec   :  { %2579 = vmatprep.subr.mxu0 %v2716_v3 }
 0x9ed   :  { %2580 = vmatpush3.msra.mxu0 %v2861_v23 }
 0x9ee   :  { %2581 = vmatprep.subr.mxu0 %v2716_v3 }
 0x9ef   :  { %2582 = vmatpush3.msra.mxu0 %v2875_v25 }
 0x9f0   :  { %2583 = vmatprep.subr.mxu0 %v2716_v3 }
 0x9f1   :  { %2584 = vmatpush3.msra.mxu0 %v2884_v26 }
 0xaaa   :  { %v1714_v8 = vpop.f32.mrf.mxu0 }
 0xaab   :  { %v1720_v10 = vadd.f32 %v2245_v7, %v1714_v8 }
 0xaac   :  { %v2568_v11 = vpop.f32.mrf.mxu0 }
 0xaad   :  { %2636 = vtanh.f32 %v1720_v10 }
 0xaae   :  { %2638 = vpow2.f32 %v331_v30 }
 0xaba   :  { %v2637_v12 = vpop.eup %2636 }
 0xabb   :  { %2569 = vmatprep.subr.mxu1 %v2637_v12  ;;  %2586 = vmatmul.mubr.msk.f32.vlgmr.msra.gmra.mxu0 %vm58_vm1, %v2637_v12  ;;  %v2639_v40 = vpop.eup %2638 }
 0xabc   :  { %2570 = vmatpush3.msra.mxu1 %v2637_v12  ;;  %2601 = vmatprep.mubr.msk.f32.mxu0 %vm135_vm2, %v2833_v14  ;;  %v851_v14 = vsub.f32 %v3006_v42, %v850_v18  ;;  %v333_v48 = vsel %vm326_vm3, %v2639_v40, 0.0  ;;  %v2252_v12 = vld [vmem:[%s3309_s0 + $0x38] sm:$0xff]  ;;  %s2718_s0 = smov [#allocation5]  }
 0xabd   :  { %2572 = vmatmul.mubr.msk.f32.vlgmr.msra.gmra.mxu1 %vm135_vm2, %v2843_v20  ;;  %2588 = vmatprep.subr.mxu1 %v2716_v3  ;;  %s2187_s14 = sshll.u32 %s2718_s0, 4  ;;  %s2188_s14 = int_to_ptr.vmem [resolvable:$true] %s2187_s14 }
 0xabe   :  { %2574 = vmatprep.mubr.msk.f32.mxu1 %vm135_vm2, %v2853_v22  ;;  %v852_v32 = vmul.f32 1.442695, %v851_v14  ;;  %s2672_s15 = scalar_lea.vmem %s2188_s14, 512  ;;  %p2677_p1 = scmp.lt.s32.totalorder %s2188_s14, %s2188_s14 }
 0xabf   :  { %p2673_p0 = scmp.ne.s32.totalorder %s2188_s14, %s2672_s15  ;;  %p2678_p2 = scmp.lt.s32.totalorder %s2672_s15, %s2672_s15 }
 0xac0   :  { %2640 = vpow2.f32 %v852_v32 }
 0xac1   :  { %2575 = vmatmul.mubr.msk.f32.gmra.mxu1 %vm135_vm2, %v2869_v24  ;;  %2642 = vpow2.f32 %v1374_v34  ;;  %v1111_v34 = vpop.xlane.xlu1 %1110  ;;  %p2679_p3 = por %p2678_p2, %p2677_p1 }
 0xac2   :  { %2596 = vmatprep.mubr.msk.f32.mxu1 %vm2717_vm0, %v2716_v3 }
 0xac3   :  { %p2680_p4 = pnand %p2679_p3, %p2673_p0 }
 0xacd   :  { %v2641_v44 = vpop.eup %2640 }
 0xace   :  { %v854_v55 = vsel %vm326_vm3, %v2641_v44, 0.0  ;;  %v2643_v61 = vpop.eup %2642 }
 0xacf   :  { %v1376_v63 = vsel %vm326_vm3, %v2643_v61, 0.0 }
 0xb7b   :  { %v1888_v35 = vpop.f32.mrf.mxu0 }
 0xb7c   :  { %v1889_v36 = vadd.f32 %v2914_v38, %v1888_v35  ;;  %v591_v35 = vmul.f32 1.442695, %v590_v33 }
 0xb7d   :  { %v2573_v37 = vpop.f32.mrf.mxu1  ;;  %v2587_v39 = vpop.f32.mrf.mxu0 }
 0xb7e   :  { %v1892_v47 = vsel %vm326_vm3, %v1889_v36, -inf  ;;  %v1812_v45 = vmul.f32 %v2573_v37, %v2902_v29 }
 0xb7f   :  { %v1788_v43 = vpop.f32.mrf.mxu1  ;;  %1893 = vmax.xlane.f32.xlu0 %v1892_v47 }
 0xb80   :  { %v1811_v51 = vmul.f32 %v1788_v43, %v2902_v29  ;;  %v3226_v56 = vadd.f32 %v1812_v45, %v1808_v49 }
 0xb81   :  { %v2576_v42 = vpop.f32.mrf.mxu1 }
 0xb82   :  { %v1814_v46 = vmul.f32 %v2576_v42, %v2902_v29  ;;  %v3234_v1 = vadd.f32 %v1811_v51, %v1807_v58  ;;  %v1906_v4 = vmul.f32 %v3226_v56, %v2798_v6  ;;  %v2069_v19 = vmul.f32 %v3226_v56, %v2897_v28 }
 0xb83   :  { %v1798_v50 = vpop.f32.mrf.mxu1  ;;  %334 = vadd.xlane.f32.xlu0 %v333_v48 }
 0xb84   :  { %v3220_v52 = vadd.f32 %v1814_v46, %v1810_v57  ;;  %v1813_v54 = vmul.f32 %v1798_v50, %v2902_v29 }
 0xb86   :  { %v1908_v59 = vmul.f32 %v3220_v52, %v2775_v0  ;;  %v3232_v60 = vadd.f32 %v1813_v54, %v1809_v53  ;;  %v1905_v0 = vmul.f32 %v3234_v1, %v2810_v9  ;;  %v2071_v48 = vmul.f32 %v3220_v52, %v2897_v28 }
 0xb87   :  { %855 = vadd.xlane.f32.xlu0 %v854_v55 }
 0xb88   :  { %v1907_v62 = vmul.f32 %v3232_v60, %v2785_v2  ;;  %2589 = vmatpush3.msra.mxu1 %v1908_v59  ;;  %v2070_v55 = vmul.f32 %v3232_v60, %v2897_v28 }
 0xb89   :  { %2590 = vmatprep.subr.mxu1 %v2716_v3 }
 0xb8a   :  { %2591 = vmatpush3.msra.mxu1 %v1907_v62 }
 0xb8b   :  { %2592 = vmatprep.subr.mxu1 %v2716_v3  ;;  %1377 = vadd.xlane.f32.xlu0 %v1376_v63 }
 0xb8c   :  { %2593 = vmatpush3.msra.mxu1 %v1906_v4 }
 0xb8d   :  { %2594 = vmatprep.subr.mxu1 %v2716_v3 }
 0xb8e   :  { %2595 = vmatpush3.msra.mxu1 %v1905_v0 }
 0xb8f   :  { %2597 = vmatmul.mubr.msk.f32.vlgmr.msra.gmra.mxu1 %vm58_vm1, %v2822_v13  ;;  %2607 = vmatprep.subr.mxu1 %v2716_v3 }
 0xb90   :  { %2608 = vmatpush3.msra.mxu1 %v2848_v21  ;;  %2615 = vmatprep.mubr.msk.f32.mxu1 %vm2717_vm0, %v2716_v3 }
 0xb91   :  { %2609 = vmatprep.subr.mxu1 %v2716_v3 }
 0xb92   :  { %2610 = vmatpush3.msra.mxu1 %v2861_v23 }
 0xb93   :  { %2611 = vmatprep.subr.mxu1 %v2716_v3 }
 0xb94   :  { %2612 = vmatpush3.msra.mxu1 %v2875_v25 }
 0xb95   :  { %2613 = vmatprep.subr.mxu1 %v2716_v3 }
 0xb96   :  { %2614 = vmatpush3.msra.mxu1 %v2884_v26 }
 0xc08   :  { %v1894_v2 = vpop.xlane.xlu0 %1893 }
 0xc09   :  { %v1895_v6 = vsub.f32 %v1889_v36, %v1894_v2  ;;  %v1112_v36 = vsub.f32 %v3053_v15, %v1111_v34 }
 0xc0b   :  { %v1896_v9 = vmul.f32 1.442695, %v1895_v6  ;;  %v1113_v37 = vmul.f32 1.442695, %v1112_v36 }
 0xc0c   :  { %v335_v13 = vpop.xlane.xlu0 %334 }
 0xc0d   :  { %2644 = vpow2.f32 %v1896_v9 }
 0xc0e   :  { %2646 = vrcp.f32 %v335_v13 }
 0xc10   :  { %v856_v21 = vpop.xlane.xlu0 %855 }
 0xc11   :  { %2648 = vrcp.f32 %v856_v21 }
 0xc14   :  { %v1378_v5 = vpop.xlane.xlu0 %1377 }
 0xc15   :  { %2650 = vrcp.f32 %v1378_v5 }
 0xc1a   :  { %v2645_v7 = vpop.eup %2644 }
 0xc1b   :  { %v2647_v23 = vpop.eup %2646  ;;  %v1898_v8 = vsel %vm326_vm3, %v2645_v7, 0.0 }
 0xc1c   :  { %v337_v10 = vmul.f32 %v2647_v23, %v2639_v40  ;;  %1899 = vadd.xlane.f32.xlu0 %v1898_v8 }
 0xc1e   :  { %v2649_v25 = vpop.eup %2648  ;;  %338 = vst.msk [vmem:[#allocation3] sm:$0xff] %vm326_vm3, %v337_v10 }
 0xc1f   :  { %v858_v3 = vmul.f32 %v2649_v25, %v2641_v44 }
 0xc21   :  { %860 = vst.msk [vmem:[#allocation3 + $0x10] sm:$0xff] %vm326_vm3, %v858_v3 }
 0xc22   :  { %v2651_v26 = vpop.eup %2650 }
 0xc23   :  { %v1380_v11 = vmul.f32 %v2651_v26, %v2643_v61 }
 0xc25   :  { %1382 = vst.msk [vmem:[#allocation3 + $0x20] sm:$0xff] %vm326_vm3, %v1380_v11 }
 0xc4f   :  { %v1975_v16 = vpop.f32.mrf.mxu1 }
 0xc50   :  { %v1981_v17 = vadd.f32 %v2252_v12, %v1975_v16 }
 0xc51   :  { %v2598_v18 = vpop.f32.mrf.mxu1 }
 0xc52   :  { %2652 = vtanh.f32 %v1981_v17 }
 0xc5f   :  { %v2653_v14 = vpop.eup %2652 }
 0xc60   :  { %2599 = vmatprep.subr.mxu0 %v2653_v14  ;;  %2616 = vmatmul.mubr.msk.f32.vlgmr.msra.gmra.mxu1 %vm58_vm1, %v2653_v14 }
 0xc61   :  { %2600 = vmatpush3.msra.mxu0 %v2653_v14 }
 0xc62   :  { %2602 = vmatmul.mubr.msk.f32.vlgmr.msra.gmra.mxu0 %vm135_vm2, %v2843_v20  ;;  %v1633_v20 = vpop.xlane.xlu1 %1632 }
 0xc63   :  { %2604 = vmatprep.mubr.msk.f32.mxu0 %vm135_vm2, %v2853_v22  ;;  %v1634_v22 = vsub.f32 %v3147_v41, %v1633_v20  ;;  %v2068_v41 = vmul.f32 %v3234_v1, %v2897_v28 }
 0xc66   :  { %2605 = vmatmul.mubr.msk.f32.gmra.mxu0 %vm135_vm2, %v2869_v24  ;;  %v1635_v24 = vmul.f32 1.442695, %v1634_v22 }
 0xca5   :  { %v1900_v30 = vpop.xlane.xlu0 %1899 }
 0xca6   :  { %2654 = vrcp.f32 %v1900_v30 }
 0xca7   :  { %2656 = vpow2.f32 %v591_v35 }
 0xca8   :  { %2658 = vpow2.f32 %v1113_v37 }
 0xca9   :  { %2660 = vpow2.f32 %v1635_v24 }
 0xcb3   :  { %v2655_v31 = vpop.eup %2654 }
 0xcb4   :  { %v1902_v32 = vmul.f32 %v2655_v31, %v2645_v7  ;;  %v2657_v42 = vpop.eup %2656 }
 0xcb5   :  { %v593_v50 = vsel %vm326_vm3, %v2657_v42, 0.0  ;;  %v2659_v51 = vpop.eup %2658 }
 0xcb6   :  { %1904 = vst.msk [vmem:[#allocation3 + $0x30] sm:$0xff] %vm326_vm3, %v1902_v32  ;;  %v1115_v52 = vsel %vm326_vm3, %v2659_v51, 0.0  ;;  %v2661_v59 = vpop.eup %2660 }
 0xcb7   :  { %v1637_v61 = vsel %vm326_vm3, %v2661_v59, 0.0 }
 0xd20   :  { %v2149_v39 = vpop.f32.mrf.mxu1 }
 0xd21   :  { %v2150_v47 = vadd.f32 %v2914_v38, %v2149_v39 }
 0xd22   :  { %v2603_v40 = vpop.f32.mrf.mxu0  ;;  %v2617_v43 = vpop.f32.mrf.mxu1 }
 0xd23   :  { %v2073_v27 = vmul.f32 %v2603_v40, %v2902_v29  ;;  %v2153_v15 = vsel %vm326_vm3, %v2150_v47, -inf }
 0xd24   :  { %2154 = vmax.xlane.f32.xlu1 %v2153_v15  ;;  %v2049_v44 = vpop.f32.mrf.mxu0 }
 0xd25   :  { %v2077_v45 = vadd.f32 %v2073_v27, %v2069_v19  ;;  %v2072_v57 = vmul.f32 %v2049_v44, %v2902_v29 }
 0xd26   :  { %v2606_v46 = vpop.f32.mrf.mxu0 }
 0xd27   :  { %2167 = vst.msk [vmem:[#allocation5 + $0x8] sm:$0xff] %vm58_vm1, %v2077_v45  ;;  %v2076_v38 = vadd.f32 %v2072_v57, %v2068_v41  ;;  %v2075_v49 = vmul.f32 %v2606_v46, %v2902_v29 }
 0xd28   :  { %594 = vadd.xlane.f32.xlu1 %v593_v50  ;;  %v2059_v53 = vpop.f32.mrf.mxu0 }
 0xd29   :  { %2166 = vst.msk [vmem:[#allocation5] sm:$0xff] %vm58_vm1, %v2076_v38  ;;  %v2079_v54 = vadd.f32 %v2075_v49, %v2071_v48  ;;  %v2074_v56 = vmul.f32 %v2059_v53, %v2902_v29 }
 0xd2b   :  { %2169 = vst.msk [vmem:[#allocation5 + $0x18] sm:$0xff] %vm58_vm1, %v2079_v54  ;;  %v2078_v58 = vadd.f32 %v2074_v56, %v2070_v55 }
 0xd2c   :  { %1116 = vadd.xlane.f32.xlu1 %v1115_v52 }
 0xd2d   :  { %2168 = vst.msk [vmem:[#allocation5 + $0x10] sm:$0xff] %vm58_vm1, %v2078_v58 }
 0xd30   :  { %1638 = vadd.xlane.f32.xlu1 %v1637_v61 }
 0xdad   :  { %v2155_v1 = vpop.xlane.xlu1 %2154 }
 0xdae   :  { %v2156_v62 = vsub.f32 %v2150_v47, %v2155_v1 }
 0xdb0   :  { %v2157_v4 = vmul.f32 1.442695, %v2156_v62 }
 0xdb1   :  { %v595_v63 = vpop.xlane.xlu1 %594 }
 0xdb2   :  { %2662 = vpow2.f32 %v2157_v4 }
 0xdb3   :  { %2664 = vrcp.f32 %v595_v63 }
 0xdb5   :  { %v1117_v28 = vpop.xlane.xlu1 %1116 }
 0xdb6   :  { %2666 = vrcp.f32 %v1117_v28 }
 0xdb9   :  { %v1639_v29 = vpop.xlane.xlu1 %1638 }
 0xdba   :  { %2668 = vrcp.f32 %v1639_v29 }
 0xdbf   :  { %v2663_v60 = vpop.eup %2662 }
 0xdc0   :  { %v2665_v0 = vpop.eup %2664  ;;  %v2159_v2 = vsel %vm326_vm3, %v2663_v60, 0.0 }
 0xdc1   :  { %v597_v6 = vmul.f32 %v2665_v0, %v2657_v42  ;;  %2160 = vadd.xlane.f32.xlu1 %v2159_v2 }
 0xdc3   :  { %v2667_v9 = vpop.eup %2666  ;;  %599 = vst.msk [vmem:[#allocation3 + $0x8] sm:$0xff] %vm326_vm3, %v597_v6 }
 0xdc4   :  { %v1119_v13 = vmul.f32 %v2667_v9, %v2659_v51 }
 0xdc6   :  { %1121 = vst.msk [vmem:[#allocation3 + $0x18] sm:$0xff] %vm326_vm3, %v1119_v13 }
 0xdc7   :  { %v2669_v21 = vpop.eup %2668 }
 0xdc8   :  { %v1641_v5 = vmul.f32 %v2669_v21, %v2661_v59 }
 0xdca   :  { %1643 = vst.msk [vmem:[#allocation3 + $0x28] sm:$0xff] %vm326_vm3, %v1641_v5 }
 0xdcb   :  { %2683 = shalt.err (!%p2680_p4)
}
 0xdcc   :  { %s2719_s16 = smov 128   ;;  %s2720_s17 = smov 8  }
 0xdcd   :  { %2193 = dma.vmem_to_hbm [thread:$0]  %s2188_s14, 512, %s3318_s9, [#allocation6], %s2719_s16, %s2719_s16, %s2720_s17  }
 0xdce   :  { %s2721_s20 = smov [#allocation3]  }
 0xdcf   :  { %s2175_s2 = sshll.u32 %s2721_s20, 4  ;;  %s2176_s2 = int_to_ptr.vmem [resolvable:$true] %s2175_s2 }
 0xdd0   :  { %s2692_s21 = scalar_lea.vmem %s2176_s2, 1024  ;;  %p2697_p6 = scmp.lt.s32.totalorder %s2176_s2, %s2176_s2 }
 0xdd1   :  { %p2693_p5 = scmp.ne.s32.totalorder %s2176_s2, %s2692_s21  ;;  %p2698_p7 = scmp.lt.s32.totalorder %s2692_s21, %s2692_s21 }
 0xdd3   :  { %p2699_p8 = por %p2698_p7, %p2697_p6 }
 0xdd5   :  { %p2700_p9 = pnand %p2699_p8, %p2693_p5 }
 0xe4a   :  { %v2161_v7 = vpop.xlane.xlu1 %2160 }
 0xe4b   :  { %2670 = vrcp.f32 %v2161_v7 }
 0xe58   :  { %v2671_v23 = vpop.eup %2670 }
 0xe59   :  { %v2163_v8 = vmul.f32 %v2671_v23, %v2663_v60 }
 0xe5b   :  { %2165 = vst.msk [vmem:[#allocation3 + $0x38] sm:$0xff] %vm326_vm3, %v2163_v8 }
 0xe5c   :  { %2703 = shalt.err (!%p2700_p9)
}
 0xe5d   :  { %2181 = dma.vmem_to_hbm [thread:$0]  %s2176_s2, 1024, %s3317_s8, [#allocation4], %s2719_s16, %s2719_s16, %s2720_s17  }
 0xe5e   :  { %2712 = dma.done.wait [#allocation4], 1024  }
 0xe5f   :  { %2713 = vsyncadd [#allocation4], 4294966272 }
 0xe60   :  { %2714 = dma.done.wait [#allocation6], 512  }
 0xe61   :  { %2715 = vsyncadd [#allocation6], 4294966784 }
 0xe62   :  { %2200 = vsyncpa [#allocation4], 1 }
 0xe63   :  { %2201 = vsyncpa [#allocation6], 1 }

</bundles_post_ra>
